<compile_context>
chip_gen: v7x
topology: tpu7x:2x2x1
jax: 0.10.0
libtpu: 0.0.40
codegen_flags: <defaults>
</compile_context>

<pallas_src>
import math

import numpy as np
import jax
import jax.numpy as jnp
from jax.experimental import pallas as pl
from jax.experimental.pallas import tpu as pltpu


def _round_up(x, m):
    return ((x + m - 1) // m) * m


def _make_octave_kernel(k, Wp, Wlp, Lf_h, Lf_l, out_h_len, out_l_len):
    f32 = jnp.float32

    def conv_taps(w_ref, x, w_row, l_valid):
        """sum_{ky,kx} W[:,:,ky,kx] @ x[:, d:d+l_valid]  with  d = ky*w_row + kx.

        x is a flattened zero-padded image (C, Lext).  Result row index i = ho*w_row+wo
        holds the conv output at (ho, wo) for wo < Wo; the other columns are garbage
        that the caller never reads (cropped in the wrapper)."""
        acc = None
        for ky in range(k):
            for kx in range(k):
                d = ky * w_row + kx
                c = jnp.dot(w_ref[ky * k + kx], x[:, d:d + l_valid],
                            preferred_element_type=f32)
                acc = c if acc is None else acc + c
        return acc

    def kernel(whh_ref, whl_ref, wlh_ref, wll_ref,   # (k*k, Cout, Cin) VMEM weights
               pool_ref, up_ref,                     # pool / upsample operator matrices
               xh_ref, xl_ref,                       # (Cin_h, Lext_h), (Cin_l, Lext_l)
               oh_ref, ol_ref):                      # (Cout_h, Ho*Wp), (Cout_l, Hol*Wlp)
        xh = xh_ref[...]
        xl = xl_ref[...]

        # AvgPool2d(2,2)(x_h), re-padded and flattened to the low-res layout,
        # for all channels at once in a single operator GEMM.
        xpd = jnp.dot(xh[:, :Lf_h], pool_ref[...], preferred_element_type=f32)

        # ---- high-frequency output: conv_h2h(x_h) + up2(conv_l2h(x_l)) -------------
        acc_hh = conv_taps(whh_ref, xh, Wp, Lf_h)       # (Cout_h, Lf_h)
        acc_lh = conv_taps(wlh_ref, xl, Wlp, Lf_l)      # (Cout_h, Lf_l)
        up = jnp.dot(acc_lh, up_ref[...], preferred_element_type=f32)   # (Cout_h, Ho*Wp)
        oh_ref[...] = (acc_hh[:, :out_h_len] + up).astype(oh_ref.dtype)

        # ---- low-frequency output: conv_h2l(pool(x_h)) + conv_l2l(x_l) -------------
        acc_hl = conv_taps(whl_ref, xpd, Wlp, Lf_l)     # (Cout_l, Lf_l)
        acc_ll = conv_taps(wll_ref, xl, Wlp, Lf_l)      # (Cout_l, Lf_l)
        ol_ref[...] = (acc_hl[:, :out_l_len] + acc_ll[:, :out_l_len]).astype(ol_ref.dtype)

    return kernel


def octave_conv_forward(x_h, x_l, w_h2h, w_h2l, w_l2h, w_l2l, *,
                        kernel_size, padding, stride=1):
    """OctaveConv forward (default config). Returns (out_h, out_l)."""
    # TODO(synk): stride=2, alpha_in/out in {0,1} (missing-branch cases), plain-tensor
    #             (non-tuple) input, bias, groups>1 and dilation>1 are not implemented.
    # TODO(synk): for very small per-image work, fold several images into one grid step
    #             to amortize the ~0.35us per-step overhead.
    assert stride == 1, "only the default stride=1 path is implemented"
    N, Cin_h, H, W = x_h.shape
    Nl, Cin_l, Hl, Wl = x_l.shape
    assert Nl == N and Hl == H // 2 and Wl == W // 2
    k, p = kernel_size, padding
    Cout_h = w_h2h.shape[0]
    Cout_l = w_l2l.shape[0]
    assert w_h2h.shape == (Cout_h, Cin_h, k, k)
    assert w_l2h.shape == (Cout_h, Cin_l, k, k)
    assert w_h2l.shape == (Cout_l, Cin_h, k, k)
    assert w_l2l.shape == (Cout_l, Cin_l, k, k)

    Hp, Wp = H + 2 * p, W + 2 * p
    Hlp, Wlp = Hl + 2 * p, Wl + 2 * p
    Ho, Wo = Hp - k + 1, Wp - k + 1              # high-res conv output
    Hol, Wol = Hlp - k + 1, Wlp - k + 1          # low-res conv output
    assert Ho == 2 * Hol and Wo == 2 * Wol, (
        "high/low branch outputs must align for the add (use 'same'-style padding)")

    # Flattened (lane-dense) padded lengths, plus a tail so every tap slice
    # [d : d + Lf] stays in bounds; rounded up to 128 lanes.
    Lf_h, Lf_l = Hp * Wp, Hlp * Wlp
    Lext_h = _round_up(Lf_h + (k - 1) * Wp + (k - 1), 128)
    Lext_l = _round_up(Lf_l + (k - 1) * Wlp + (k - 1), 128)
    out_h_len = Ho * Wp          # stored slab; wrapper crops the (Wp - Wo) garbage cols
    out_l_len = Hol * Wlp

    # ---- constant operators (host-built) ------------------------------------------
    # pool_op: flattened-padded x_h  ->  flattened-padded AvgPool2d(2,2)(x_h)
    pool_op = np.zeros((Lf_h, Lext_l), np.float32)
    hl, wl = np.arange(Hl), np.arange(Wl)
    jj = ((hl[:, None] + p) * Wlp + (wl[None, :] + p)).ravel()
    for dy in range(2):
        for dx in range(2):
            ii = ((2 * hl[:, None] + dy + p) * Wp + (2 * wl[None, :] + dx + p)).ravel()
            pool_op[ii, jj] = 0.25
    # up_op: low-res conv accumulator -> nearest-x2 upsampled high-res output slab
    # TODO(synk): for large spatial dims, replace these dense flattened operators by
    #             factored per-axis (row/column) operators to cut operator-GEMM FLOPs.
    up_op = np.zeros((Lf_l, out_h_len), np.float32)
    ho, wo = np.arange(Ho), np.arange(Wo)
    jj = (ho[:, None] * Wp + wo[None, :]).ravel()
    ii = ((ho[:, None] // 2) * Wlp + (wo[None, :] // 2)).ravel()
    up_op[ii, jj] = 1.0
    pool_op = jnp.asarray(pool_op)
    up_op = jnp.asarray(up_op)

    # ---- weights as (k*k, Cout, Cin) MXU matrices ----------------------------------
    def wmat(w):
        co, ci = w.shape[0], w.shape[1]
        return jnp.transpose(w, (2, 3, 0, 1)).reshape(k * k, co, ci).astype(x_h.dtype)

    whh, whl, wlh, wll = wmat(w_h2h), wmat(w_h2l), wmat(w_l2h), wmat(w_l2l)

    # ---- inputs: zero-pad, flatten spatial onto lanes, add shift tail --------------
    def flatten_padded(x, hpad, wpad, lext):
        n, c = x.shape[:2]
        xp = jnp.pad(x, ((0, 0), (0, 0), (p, p), (p, p)))
        xf = xp.reshape(n, c, hpad * wpad)
        return jnp.pad(xf, ((0, 0), (0, 0), (0, lext - hpad * wpad)))

    xh_in = flatten_padded(x_h, Hp, Wp, Lext_h)
    xl_in = flatten_padded(x_l, Hlp, Wlp, Lext_l)

    kernel = _make_octave_kernel(k, Wp, Wlp, Lf_h, Lf_l, out_h_len, out_l_len)

    def full2(arr):
        return pl.BlockSpec(arr.shape, lambda n: (0, 0))

    def full3(arr):
        return pl.BlockSpec(arr.shape, lambda n: (0, 0, 0))

    grid_spec = pltpu.PrefetchScalarGridSpec(
        num_scalar_prefetch=0,
        grid=(N,),
        in_specs=[
            full3(whh), full3(whl), full3(wlh), full3(wll),
            full2(pool_op), full2(up_op),
            pl.BlockSpec((None, Cin_h, Lext_h), lambda n: (n, 0, 0)),
            pl.BlockSpec((None, Cin_l, Lext_l), lambda n: (n, 0, 0)),
        ],
        out_specs=[
            pl.BlockSpec((None, Cout_h, out_h_len), lambda n: (n, 0, 0)),
            pl.BlockSpec((None, Cout_l, out_l_len), lambda n: (n, 0, 0)),
        ],
    )

    oh_flat, ol_flat = pl.pallas_call(
        kernel,
        out_shape=(jax.ShapeDtypeStruct((N, Cout_h, out_h_len), x_h.dtype),
                   jax.ShapeDtypeStruct((N, Cout_l, out_l_len), x_l.dtype)),
        grid_spec=grid_spec,
        compiler_params=pltpu.CompilerParams(
            dimension_semantics=("parallel",),
        ),
    )(whh, whl, wlh, wll, pool_op, up_op, xh_in, xl_in)

    # Crop the per-row garbage columns and restore NCHW.
    out_h = oh_flat.reshape(N, Cout_h, Ho, Wp)[:, :, :, :Wo]
    out_l = ol_flat.reshape(N, Cout_l, Hol, Wlp)[:, :, :, :Wol]
    return out_h, out_l


def _reference_octave_forward(x_h, x_l, w_h2h, w_h2l, w_l2h, w_l2l, *, padding):
    """Plain-JAX reference mirroring the PyTorch forward (stride=1, tuple input)."""
    def conv(x, w):
        return jax.lax.conv_general_dilated(
            x, w, window_strides=(1, 1),
            padding=((padding, padding), (padding, padding)),
            dimension_numbers=("NCHW", "OIHW", "NCHW"),
            precision=jax.lax.Precision.HIGHEST)

    def down(x):
        N, C, H, W = x.shape
        return x.reshape(N, C, H // 2, 2, W // 2, 2).mean(axis=(3, 5))

    def up(x):
        return jnp.repeat(jnp.repeat(x, 2, axis=2), 2, axis=3)

    x_h2h = conv(x_h, w_h2h)
    x_h2l = conv(down(x_h), w_h2l)
    x_l2h = up(conv(x_l, w_l2h))
    x_l2l = conv(x_l, w_l2l)
    return x_h2h + x_l2h, x_h2l + x_l2l


if __name__ == "__main__":
    key = jax.random.PRNGKey(0)
    N = 2
    in_channels, out_channels = 4, 4
    alpha_in = alpha_out = 0.5
    kernel_size, padding, stride = 3, 1, 1
    H = W = 16

    cin_l = int(alpha_in * in_channels); cin_h = in_channels - cin_l
    cout_l = int(alpha_out * out_channels); cout_h = out_channels - cout_l

    k_xh, k_xl, k1, k2, k3, k4 = jax.random.split(key, 6)
    x_h = jax.random.normal(k_xh, (N, cin_h, H, W), dtype=jnp.float32)
    x_l = jax.random.normal(k_xl, (N, cin_l, H // 2, W // 2), dtype=jnp.float32)
    scale = 1.0 / math.sqrt(cin_h * kernel_size * kernel_size)
    w_h2h = scale * jax.random.normal(k1, (cout_h, cin_h, kernel_size, kernel_size), jnp.float32)
    w_h2l = scale * jax.random.normal(k2, (cout_l, cin_h, kernel_size, kernel_size), jnp.float32)
    w_l2h = scale * jax.random.normal(k3, (cout_h, cin_l, kernel_size, kernel_size), jnp.float32)
    w_l2l = scale * jax.random.normal(k4, (cout_l, cin_l, kernel_size, kernel_size), jnp.float32)

    out_h, out_l = octave_conv_forward(
        x_h, x_l, w_h2h, w_h2l, w_l2h, w_l2l,
        kernel_size=kernel_size, padding=padding, stride=stride)
    out_h, out_l = jax.block_until_ready((out_h, out_l))

    ref_h, ref_l = _reference_octave_forward(
        x_h, x_l, w_h2h, w_h2l, w_l2h, w_l2l, padding=padding)

    assert out_h.shape == (N, cout_h, H, W), out_h.shape
    assert out_l.shape == (N, cout_l, H // 2, W // 2), out_l.shape
    err_h = float(jnp.max(jnp.abs(out_h - ref_h)))
    err_l = float(jnp.max(jnp.abs(out_l - ref_l)))
    # MXU f32 matmuls are not bit-identical to the HIGHEST-precision XLA reference.
    assert err_h < 1e-3 and err_l < 1e-3, (err_h, err_l)

    print("KERNEL_OK")
</pallas_src>

<mosaic_0001>
module attributes {stable_mosaic.version = 11 : i64} {
  func.func @kernel(%arg0: i32, %arg1: memref<9x2x2xf32, #tpu.memory_space<vmem>>, %arg2: memref<9x2x2xf32, #tpu.memory_space<vmem>>, %arg3: memref<9x2x2xf32, #tpu.memory_space<vmem>>, %arg4: memref<9x2x2xf32, #tpu.memory_space<vmem>>, %arg5: memref<324x128xf32, #tpu.memory_space<vmem>>, %arg6: memref<100x288xf32, #tpu.memory_space<vmem>>, %arg7: memref<1x2x384xf32, #tpu.memory_space<vmem>>, %arg8: memref<1x2x128xf32, #tpu.memory_space<vmem>>, %arg9: memref<1x2x288xf32, #tpu.memory_space<vmem>>, %arg10: memref<1x2x80xf32, #tpu.memory_space<vmem>>) attributes {dimension_semantics = [#tpu.dimension_semantics<parallel>], iteration_bounds = array<i64: 2>, scalar_prefetch = 0 : i64, scratch_operands = 0 : i64, tpu.core_type = #tpu.core_type<tc>, window_params = [{pipeline_mode = #tpu.pipeline_mode<synchronous>, transform_indices = @transform_0, window_bounds = array<i64: 9, 2, 2>}, {pipeline_mode = #tpu.pipeline_mode<synchronous>, transform_indices = @transform_1, window_bounds = array<i64: 9, 2, 2>}, {pipeline_mode = #tpu.pipeline_mode<synchronous>, transform_indices = @transform_2, window_bounds = array<i64: 9, 2, 2>}, {pipeline_mode = #tpu.pipeline_mode<synchronous>, transform_indices = @transform_3, window_bounds = array<i64: 9, 2, 2>}, {pipeline_mode = #tpu.pipeline_mode<synchronous>, transform_indices = @transform_4, window_bounds = array<i64: 324, 128>}, {pipeline_mode = #tpu.pipeline_mode<synchronous>, transform_indices = @transform_5, window_bounds = array<i64: 100, 288>}, {transform_indices = @transform_6, window_bounds = array<i64: 1, 2, 384>}, {transform_indices = @transform_7, window_bounds = array<i64: 1, 2, 128>}, {transform_indices = @transform_8, window_bounds = array<i64: 1, 2, 288>}, {transform_indices = @transform_9, window_bounds = array<i64: 1, 2, 80>}]} {
    %c0 = arith.constant 0 : index
    %c0_0 = arith.constant 0 : index
    %c0_1 = arith.constant 0 : index
    %0 = vector.load %arg7[%c0, %c0_0, %c0_1] : memref<1x2x384xf32, #tpu.memory_space<vmem>>, vector<1x2x384xf32>
    %1 = vector.shape_cast %0 : vector<1x2x384xf32> to vector<2x384xf32>
    %c0_2 = arith.constant 0 : index
    %c0_3 = arith.constant 0 : index
    %c0_4 = arith.constant 0 : index
    %2 = vector.load %arg8[%c0_2, %c0_3, %c0_4] : memref<1x2x128xf32, #tpu.memory_space<vmem>>, vector<1x2x128xf32>
    %3 = vector.shape_cast %2 : vector<1x2x128xf32> to vector<2x128xf32>
    %4 = vector.extract_strided_slice %1 {offsets = [0, 0], sizes = [2, 324], strides = [1, 1]} : vector<2x384xf32> to vector<2x324xf32>
    %c0_5 = arith.constant 0 : index
    %c0_6 = arith.constant 0 : index
    %5 = vector.load %arg5[%c0_5, %c0_6] : memref<324x128xf32, #tpu.memory_space<vmem>>, vector<324x128xf32>
    %cst = arith.constant dense<0.000000e+00> : vector<2x128xf32>
    %6 = tpu.matmul %4, %5, %cst {dimension_numbers = #tpu.dot_dimension_numbers<[1], [0], [0], [1], [0, 0, 1, 1], [], []>} : vector<2x324xf32>, vector<324x128xf32>, vector<2x128xf32> -> vector<2x128xf32>
    %c0_7 = arith.constant 0 : index
    %c0_8 = arith.constant 0 : index
    %c0_9 = arith.constant 0 : index
    %7 = vector.load %arg1[%c0_7, %c0_8, %c0_9] : memref<9x2x2xf32, #tpu.memory_space<vmem>>, vector<1x2x2xf32>
    %8 = vector.shape_cast %7 : vector<1x2x2xf32> to vector<2x2xf32>
    %9 = vector.extract_strided_slice %1 {offsets = [0, 0], sizes = [2, 324], strides = [1, 1]} : vector<2x384xf32> to vector<2x324xf32>
    %cst_10 = arith.constant dense<0.000000e+00> : vector<2x324xf32>
    %10 = tpu.matmul %8, %9, %cst_10 {dimension_numbers = #tpu.dot_dimension_numbers<[1], [0], [0], [1], [0, 0, 1, 1], [], []>} : vector<2x2xf32>, vector<2x324xf32>, vector<2x324xf32> -> vector<2x324xf32>
    %c1 = arith.constant 1 : index
    %c0_11 = arith.constant 0 : index
    %c0_12 = arith.constant 0 : index
    %11 = vector.load %arg1[%c1, %c0_11, %c0_12] : memref<9x2x2xf32, #tpu.memory_space<vmem>>, vector<1x2x2xf32>
    %12 = vector.shape_cast %11 : vector<1x2x2xf32> to vector<2x2xf32>
    %13 = vector.extract_strided_slice %1 {offsets = [0, 1], sizes = [2, 324], strides = [1, 1]} : vector<2x384xf32> to vector<2x324xf32>
    %cst_13 = arith.constant dense<0.000000e+00> : vector<2x324xf32>
    %14 = tpu.matmul %12, %13, %cst_13 {dimension_numbers = #tpu.dot_dimension_numbers<[1], [0], [0], [1], [0, 0, 1, 1], [], []>} : vector<2x2xf32>, vector<2x324xf32>, vector<2x324xf32> -> vector<2x324xf32>
    %15 = arith.addf %10, %14 : vector<2x324xf32>
    %c2 = arith.constant 2 : index
    %c0_14 = arith.constant 0 : index
    %c0_15 = arith.constant 0 : index
    %16 = vector.load %arg1[%c2, %c0_14, %c0_15] : memref<9x2x2xf32, #tpu.memory_space<vmem>>, vector<1x2x2xf32>
    %17 = vector.shape_cast %16 : vector<1x2x2xf32> to vector<2x2xf32>
    %18 = vector.extract_strided_slice %1 {offsets = [0, 2], sizes = [2, 324], strides = [1, 1]} : vector<2x384xf32> to vector<2x324xf32>
    %cst_16 = arith.constant dense<0.000000e+00> : vector<2x324xf32>
    %19 = tpu.matmul %17, %18, %cst_16 {dimension_numbers = #tpu.dot_dimension_numbers<[1], [0], [0], [1], [0, 0, 1, 1], [], []>} : vector<2x2xf32>, vector<2x324xf32>, vector<2x324xf32> -> vector<2x324xf32>
    %20 = arith.addf %15, %19 : vector<2x324xf32>
    %c3 = arith.constant 3 : index
    %c0_17 = arith.constant 0 : index
    %c0_18 = arith.constant 0 : index
    %21 = vector.load %arg1[%c3, %c0_17, %c0_18] : memref<9x2x2xf32, #tpu.memory_space<vmem>>, vector<1x2x2xf32>
    %22 = vector.shape_cast %21 : vector<1x2x2xf32> to vector<2x2xf32>
    %23 = vector.extract_strided_slice %1 {offsets = [0, 18], sizes = [2, 324], strides = [1, 1]} : vector<2x384xf32> to vector<2x324xf32>
    %cst_19 = arith.constant dense<0.000000e+00> : vector<2x324xf32>
    %24 = tpu.matmul %22, %23, %cst_19 {dimension_numbers = #tpu.dot_dimension_numbers<[1], [0], [0], [1], [0, 0, 1, 1], [], []>} : vector<2x2xf32>, vector<2x324xf32>, vector<2x324xf32> -> vector<2x324xf32>
    %25 = arith.addf %20, %24 : vector<2x324xf32>
    %c4 = arith.constant 4 : index
    %c0_20 = arith.constant 0 : index
    %c0_21 = arith.constant 0 : index
    %26 = vector.load %arg1[%c4, %c0_20, %c0_21] : memref<9x2x2xf32, #tpu.memory_space<vmem>>, vector<1x2x2xf32>
    %27 = vector.shape_cast %26 : vector<1x2x2xf32> to vector<2x2xf32>
    %28 = vector.extract_strided_slice %1 {offsets = [0, 19], sizes = [2, 324], strides = [1, 1]} : vector<2x384xf32> to vector<2x324xf32>
    %cst_22 = arith.constant dense<0.000000e+00> : vector<2x324xf32>
    %29 = tpu.matmul %27, %28, %cst_22 {dimension_numbers = #tpu.dot_dimension_numbers<[1], [0], [0], [1], [0, 0, 1, 1], [], []>} : vector<2x2xf32>, vector<2x324xf32>, vector<2x324xf32> -> vector<2x324xf32>
    %30 = arith.addf %25, %29 : vector<2x324xf32>
    %c5 = arith.constant 5 : index
    %c0_23 = arith.constant 0 : index
    %c0_24 = arith.constant 0 : index
    %31 = vector.load %arg1[%c5, %c0_23, %c0_24] : memref<9x2x2xf32, #tpu.memory_space<vmem>>, vector<1x2x2xf32>
    %32 = vector.shape_cast %31 : vector<1x2x2xf32> to vector<2x2xf32>
    %33 = vector.extract_strided_slice %1 {offsets = [0, 20], sizes = [2, 324], strides = [1, 1]} : vector<2x384xf32> to vector<2x324xf32>
    %cst_25 = arith.constant dense<0.000000e+00> : vector<2x324xf32>
    %34 = tpu.matmul %32, %33, %cst_25 {dimension_numbers = #tpu.dot_dimension_numbers<[1], [0], [0], [1], [0, 0, 1, 1], [], []>} : vector<2x2xf32>, vector<2x324xf32>, vector<2x324xf32> -> vector<2x324xf32>
    %35 = arith.addf %30, %34 : vector<2x324xf32>
    %c6 = arith.constant 6 : index
    %c0_26 = arith.constant 0 : index
    %c0_27 = arith.constant 0 : index
    %36 = vector.load %arg1[%c6, %c0_26, %c0_27] : memref<9x2x2xf32, #tpu.memory_space<vmem>>, vector<1x2x2xf32>
    %37 = vector.shape_cast %36 : vector<1x2x2xf32> to vector<2x2xf32>
    %38 = vector.extract_strided_slice %1 {offsets = [0, 36], sizes = [2, 324], strides = [1, 1]} : vector<2x384xf32> to vector<2x324xf32>
    %cst_28 = arith.constant dense<0.000000e+00> : vector<2x324xf32>
    %39 = tpu.matmul %37, %38, %cst_28 {dimension_numbers = #tpu.dot_dimension_numbers<[1], [0], [0], [1], [0, 0, 1, 1], [], []>} : vector<2x2xf32>, vector<2x324xf32>, vector<2x324xf32> -> vector<2x324xf32>
    %40 = arith.addf %35, %39 : vector<2x324xf32>
    %c7 = arith.constant 7 : index
    %c0_29 = arith.constant 0 : index
    %c0_30 = arith.constant 0 : index
    %41 = vector.load %arg1[%c7, %c0_29, %c0_30] : memref<9x2x2xf32, #tpu.memory_space<vmem>>, vector<1x2x2xf32>
    %42 = vector.shape_cast %41 : vector<1x2x2xf32> to vector<2x2xf32>
    %43 = vector.extract_strided_slice %1 {offsets = [0, 37], sizes = [2, 324], strides = [1, 1]} : vector<2x384xf32> to vector<2x324xf32>
    %cst_31 = arith.constant dense<0.000000e+00> : vector<2x324xf32>
    %44 = tpu.matmul %42, %43, %cst_31 {dimension_numbers = #tpu.dot_dimension_numbers<[1], [0], [0], [1], [0, 0, 1, 1], [], []>} : vector<2x2xf32>, vector<2x324xf32>, vector<2x324xf32> -> vector<2x324xf32>
    %45 = arith.addf %40, %44 : vector<2x324xf32>
    %c8 = arith.constant 8 : index
    %c0_32 = arith.constant 0 : index
    %c0_33 = arith.constant 0 : index
    %46 = vector.load %arg1[%c8, %c0_32, %c0_33] : memref<9x2x2xf32, #tpu.memory_space<vmem>>, vector<1x2x2xf32>
    %47 = vector.shape_cast %46 : vector<1x2x2xf32> to vector<2x2xf32>
    %48 = vector.extract_strided_slice %1 {offsets = [0, 38], sizes = [2, 324], strides = [1, 1]} : vector<2x384xf32> to vector<2x324xf32>
    %cst_34 = arith.constant dense<0.000000e+00> : vector<2x324xf32>
    %49 = tpu.matmul %47, %48, %cst_34 {dimension_numbers = #tpu.dot_dimension_numbers<[1], [0], [0], [1], [0, 0, 1, 1], [], []>} : vector<2x2xf32>, vector<2x324xf32>, vector<2x324xf32> -> vector<2x324xf32>
    %50 = arith.addf %45, %49 : vector<2x324xf32>
    %c0_35 = arith.constant 0 : index
    %c0_36 = arith.constant 0 : index
    %c0_37 = arith.constant 0 : index
    %51 = vector.load %arg3[%c0_35, %c0_36, %c0_37] : memref<9x2x2xf32, #tpu.memory_space<vmem>>, vector<1x2x2xf32>
    %52 = vector.shape_cast %51 : vector<1x2x2xf32> to vector<2x2xf32>
    %53 = vector.extract_strided_slice %3 {offsets = [0, 0], sizes = [2, 100], strides = [1, 1]} : vector<2x128xf32> to vector<2x100xf32>
    %cst_38 = arith.constant dense<0.000000e+00> : vector<2x100xf32>
    %54 = tpu.matmul %52, %53, %cst_38 {dimension_numbers = #tpu.dot_dimension_numbers<[1], [0], [0], [1], [0, 0, 1, 1], [], []>} : vector<2x2xf32>, vector<2x100xf32>, vector<2x100xf32> -> vector<2x100xf32>
    %c1_39 = arith.constant 1 : index
    %c0_40 = arith.constant 0 : index
    %c0_41 = arith.constant 0 : index
    %55 = vector.load %arg3[%c1_39, %c0_40, %c0_41] : memref<9x2x2xf32, #tpu.memory_space<vmem>>, vector<1x2x2xf32>
    %56 = vector.shape_cast %55 : vector<1x2x2xf32> to vector<2x2xf32>
    %57 = vector.extract_strided_slice %3 {offsets = [0, 1], sizes = [2, 100], strides = [1, 1]} : vector<2x128xf32> to vector<2x100xf32>
    %cst_42 = arith.constant dense<0.000000e+00> : vector<2x100xf32>
    %58 = tpu.matmul %56, %57, %cst_42 {dimension_numbers = #tpu.dot_dimension_numbers<[1], [0], [0], [1], [0, 0, 1, 1], [], []>} : vector<2x2xf32>, vector<2x100xf32>, vector<2x100xf32> -> vector<2x100xf32>
    %59 = arith.addf %54, %58 : vector<2x100xf32>
    %c2_43 = arith.constant 2 : index
    %c0_44 = arith.constant 0 : index
    %c0_45 = arith.constant 0 : index
    %60 = vector.load %arg3[%c2_43, %c0_44, %c0_45] : memref<9x2x2xf32, #tpu.memory_space<vmem>>, vector<1x2x2xf32>
    %61 = vector.shape_cast %60 : vector<1x2x2xf32> to vector<2x2xf32>
    %62 = vector.extract_strided_slice %3 {offsets = [0, 2], sizes = [2, 100], strides = [1, 1]} : vector<2x128xf32> to vector<2x100xf32>
    %cst_46 = arith.constant dense<0.000000e+00> : vector<2x100xf32>
    %63 = tpu.matmul %61, %62, %cst_46 {dimension_numbers = #tpu.dot_dimension_numbers<[1], [0], [0], [1], [0, 0, 1, 1], [], []>} : vector<2x2xf32>, vector<2x100xf32>, vector<2x100xf32> -> vector<2x100xf32>
    %64 = arith.addf %59, %63 : vector<2x100xf32>
    %c3_47 = arith.constant 3 : index
    %c0_48 = arith.constant 0 : index
    %c0_49 = arith.constant 0 : index
    %65 = vector.load %arg3[%c3_47, %c0_48, %c0_49] : memref<9x2x2xf32, #tpu.memory_space<vmem>>, vector<1x2x2xf32>
    %66 = vector.shape_cast %65 : vector<1x2x2xf32> to vector<2x2xf32>
    %67 = vector.extract_strided_slice %3 {offsets = [0, 10], sizes = [2, 100], strides = [1, 1]} : vector<2x128xf32> to vector<2x100xf32>
    %cst_50 = arith.constant dense<0.000000e+00> : vector<2x100xf32>
    %68 = tpu.matmul %66, %67, %cst_50 {dimension_numbers = #tpu.dot_dimension_numbers<[1], [0], [0], [1], [0, 0, 1, 1], [], []>} : vector<2x2xf32>, vector<2x100xf32>, vector<2x100xf32> -> vector<2x100xf32>
    %69 = arith.addf %64, %68 : vector<2x100xf32>
    %c4_51 = arith.constant 4 : index
    %c0_52 = arith.constant 0 : index
    %c0_53 = arith.constant 0 : index
    %70 = vector.load %arg3[%c4_51, %c0_52, %c0_53] : memref<9x2x2xf32, #tpu.memory_space<vmem>>, vector<1x2x2xf32>
    %71 = vector.shape_cast %70 : vector<1x2x2xf32> to vector<2x2xf32>
    %72 = vector.extract_strided_slice %3 {offsets = [0, 11], sizes = [2, 100], strides = [1, 1]} : vector<2x128xf32> to vector<2x100xf32>
    %cst_54 = arith.constant dense<0.000000e+00> : vector<2x100xf32>
    %73 = tpu.matmul %71, %72, %cst_54 {dimension_numbers = #tpu.dot_dimension_numbers<[1], [0], [0], [1], [0, 0, 1, 1], [], []>} : vector<2x2xf32>, vector<2x100xf32>, vector<2x100xf32> -> vector<2x100xf32>
    %74 = arith.addf %69, %73 : vector<2x100xf32>
    %c5_55 = arith.constant 5 : index
    %c0_56 = arith.constant 0 : index
    %c0_57 = arith.constant 0 : index
    %75 = vector.load %arg3[%c5_55, %c0_56, %c0_57] : memref<9x2x2xf32, #tpu.memory_space<vmem>>, vector<1x2x2xf32>
    %76 = vector.shape_cast %75 : vector<1x2x2xf32> to vector<2x2xf32>
    %77 = vector.extract_strided_slice %3 {offsets = [0, 12], sizes = [2, 100], strides = [1, 1]} : vector<2x128xf32> to vector<2x100xf32>
    %cst_58 = arith.constant dense<0.000000e+00> : vector<2x100xf32>
    %78 = tpu.matmul %76, %77, %cst_58 {dimension_numbers = #tpu.dot_dimension_numbers<[1], [0], [0], [1], [0, 0, 1, 1], [], []>} : vector<2x2xf32>, vector<2x100xf32>, vector<2x100xf32> -> vector<2x100xf32>
    %79 = arith.addf %74, %78 : vector<2x100xf32>
    %c6_59 = arith.constant 6 : index
    %c0_60 = arith.constant 0 : index
    %c0_61 = arith.constant 0 : index
    %80 = vector.load %arg3[%c6_59, %c0_60, %c0_61] : memref<9x2x2xf32, #tpu.memory_space<vmem>>, vector<1x2x2xf32>
    %81 = vector.shape_cast %80 : vector<1x2x2xf32> to vector<2x2xf32>
    %82 = vector.extract_strided_slice %3 {offsets = [0, 20], sizes = [2, 100], strides = [1, 1]} : vector<2x128xf32> to vector<2x100xf32>
    %cst_62 = arith.constant dense<0.000000e+00> : vector<2x100xf32>
    %83 = tpu.matmul %81, %82, %cst_62 {dimension_numbers = #tpu.dot_dimension_numbers<[1], [0], [0], [1], [0, 0, 1, 1], [], []>} : vector<2x2xf32>, vector<2x100xf32>, vector<2x100xf32> -> vector<2x100xf32>
    %84 = arith.addf %79, %83 : vector<2x100xf32>
    %c7_63 = arith.constant 7 : index
    %c0_64 = arith.constant 0 : index
    %c0_65 = arith.constant 0 : index
    %85 = vector.load %arg3[%c7_63, %c0_64, %c0_65] : memref<9x2x2xf32, #tpu.memory_space<vmem>>, vector<1x2x2xf32>
    %86 = vector.shape_cast %85 : vector<1x2x2xf32> to vector<2x2xf32>
    %87 = vector.extract_strided_slice %3 {offsets = [0, 21], sizes = [2, 100], strides = [1, 1]} : vector<2x128xf32> to vector<2x100xf32>
    %cst_66 = arith.constant dense<0.000000e+00> : vector<2x100xf32>
    %88 = tpu.matmul %86, %87, %cst_66 {dimension_numbers = #tpu.dot_dimension_numbers<[1], [0], [0], [1], [0, 0, 1, 1], [], []>} : vector<2x2xf32>, vector<2x100xf32>, vector<2x100xf32> -> vector<2x100xf32>
    %89 = arith.addf %84, %88 : vector<2x100xf32>
    %c8_67 = arith.constant 8 : index
    %c0_68 = arith.constant 0 : index
    %c0_69 = arith.constant 0 : index
    %90 = vector.load %arg3[%c8_67, %c0_68, %c0_69] : memref<9x2x2xf32, #tpu.memory_space<vmem>>, vector<1x2x2xf32>
    %91 = vector.shape_cast %90 : vector<1x2x2xf32> to vector<2x2xf32>
    %92 = vector.extract_strided_slice %3 {offsets = [0, 22], sizes = [2, 100], strides = [1, 1]} : vector<2x128xf32> to vector<2x100xf32>
    %cst_70 = arith.constant dense<0.000000e+00> : vector<2x100xf32>
    %93 = tpu.matmul %91, %92, %cst_70 {dimension_numbers = #tpu.dot_dimension_numbers<[1], [0], [0], [1], [0, 0, 1, 1], [], []>} : vector<2x2xf32>, vector<2x100xf32>, vector<2x100xf32> -> vector<2x100xf32>
    %94 = arith.addf %89, %93 : vector<2x100xf32>
    %c0_71 = arith.constant 0 : index
    %c0_72 = arith.constant 0 : index
    %95 = vector.load %arg6[%c0_71, %c0_72] : memref<100x288xf32, #tpu.memory_space<vmem>>, vector<100x288xf32>
    %cst_73 = arith.constant dense<0.000000e+00> : vector<2x288xf32>
    %96 = tpu.matmul %94, %95, %cst_73 {dimension_numbers = #tpu.dot_dimension_numbers<[1], [0], [0], [1], [0, 0, 1, 1], [], []>} : vector<2x100xf32>, vector<100x288xf32>, vector<2x288xf32> -> vector<2x288xf32>
    %97 = vector.extract_strided_slice %50 {offsets = [0, 0], sizes = [2, 288], strides = [1, 1]} : vector<2x324xf32> to vector<2x288xf32>
    %98 = arith.addf %97, %96 : vector<2x288xf32>
    %c0_74 = arith.constant 0 : index
    %c0_75 = arith.constant 0 : index
    %c0_76 = arith.constant 0 : index
    %99 = vector.load %arg9[%c0_74, %c0_75, %c0_76] : memref<1x2x288xf32, #tpu.memory_space<vmem>>, vector<1x2x288xf32>
    %100 = vector.shape_cast %99 : vector<1x2x288xf32> to vector<2x288xf32>
    %101 = vector.shape_cast %98 : vector<2x288xf32> to vector<1x2x288xf32>
    tpu.vector_store %arg9[%c0_74, %c0_75, %c0_76], %101 {strides = array<i32>} : memref<1x2x288xf32, #tpu.memory_space<vmem>>, vector<1x2x288xf32>,
    %c0_77 = arith.constant 0 : index
    %c0_78 = arith.constant 0 : index
    %c0_79 = arith.constant 0 : index
    %102 = vector.load %arg2[%c0_77, %c0_78, %c0_79] : memref<9x2x2xf32, #tpu.memory_space<vmem>>, vector<1x2x2xf32>
    %103 = vector.shape_cast %102 : vector<1x2x2xf32> to vector<2x2xf32>
    %104 = vector.extract_strided_slice %6 {offsets = [0, 0], sizes = [2, 100], strides = [1, 1]} : vector<2x128xf32> to vector<2x100xf32>
    %cst_80 = arith.constant dense<0.000000e+00> : vector<2x100xf32>
    %105 = tpu.matmul %103, %104, %cst_80 {dimension_numbers = #tpu.dot_dimension_numbers<[1], [0], [0], [1], [0, 0, 1, 1], [], []>} : vector<2x2xf32>, vector<2x100xf32>, vector<2x100xf32> -> vector<2x100xf32>
    %c1_81 = arith.constant 1 : index
    %c0_82 = arith.constant 0 : index
    %c0_83 = arith.constant 0 : index
    %106 = vector.load %arg2[%c1_81, %c0_82, %c0_83] : memref<9x2x2xf32, #tpu.memory_space<vmem>>, vector<1x2x2xf32>
    %107 = vector.shape_cast %106 : vector<1x2x2xf32> to vector<2x2xf32>
    %108 = vector.extract_strided_slice %6 {offsets = [0, 1], sizes = [2, 100], strides = [1, 1]} : vector<2x128xf32> to vector<2x100xf32>
    %cst_84 = arith.constant dense<0.000000e+00> : vector<2x100xf32>
    %109 = tpu.matmul %107, %108, %cst_84 {dimension_numbers = #tpu.dot_dimension_numbers<[1], [0], [0], [1], [0, 0, 1, 1], [], []>} : vector<2x2xf32>, vector<2x100xf32>, vector<2x100xf32> -> vector<2x100xf32>
    %110 = arith.addf %105, %109 : vector<2x100xf32>
    %c2_85 = arith.constant 2 : index
    %c0_86 = arith.constant 0 : index
    %c0_87 = arith.constant 0 : index
    %111 = vector.load %arg2[%c2_85, %c0_86, %c0_87] : memref<9x2x2xf32, #tpu.memory_space<vmem>>, vector<1x2x2xf32>
    %112 = vector.shape_cast %111 : vector<1x2x2xf32> to vector<2x2xf32>
    %113 = vector.extract_strided_slice %6 {offsets = [0, 2], sizes = [2, 100], strides = [1, 1]} : vector<2x128xf32> to vector<2x100xf32>
    %cst_88 = arith.constant dense<0.000000e+00> : vector<2x100xf32>
    %114 = tpu.matmul %112, %113, %cst_88 {dimension_numbers = #tpu.dot_dimension_numbers<[1], [0], [0], [1], [0, 0, 1, 1], [], []>} : vector<2x2xf32>, vector<2x100xf32>, vector<2x100xf32> -> vector<2x100xf32>
    %115 = arith.addf %110, %114 : vector<2x100xf32>
    %c3_89 = arith.constant 3 : index
    %c0_90 = arith.constant 0 : index
    %c0_91 = arith.constant 0 : index
    %116 = vector.load %arg2[%c3_89, %c0_90, %c0_91] : memref<9x2x2xf32, #tpu.memory_space<vmem>>, vector<1x2x2xf32>
    %117 = vector.shape_cast %116 : vector<1x2x2xf32> to vector<2x2xf32>
    %118 = vector.extract_strided_slice %6 {offsets = [0, 10], sizes = [2, 100], strides = [1, 1]} : vector<2x128xf32> to vector<2x100xf32>
    %cst_92 = arith.constant dense<0.000000e+00> : vector<2x100xf32>
    %119 = tpu.matmul %117, %118, %cst_92 {dimension_numbers = #tpu.dot_dimension_numbers<[1], [0], [0], [1], [0, 0, 1, 1], [], []>} : vector<2x2xf32>, vector<2x100xf32>, vector<2x100xf32> -> vector<2x100xf32>
    %120 = arith.addf %115, %119 : vector<2x100xf32>
    %c4_93 = arith.constant 4 : index
    %c0_94 = arith.constant 0 : index
    %c0_95 = arith.constant 0 : index
    %121 = vector.load %arg2[%c4_93, %c0_94, %c0_95] : memref<9x2x2xf32, #tpu.memory_space<vmem>>, vector<1x2x2xf32>
    %122 = vector.shape_cast %121 : vector<1x2x2xf32> to vector<2x2xf32>
    %123 = vector.extract_strided_slice %6 {offsets = [0, 11], sizes = [2, 100], strides = [1, 1]} : vector<2x128xf32> to vector<2x100xf32>
    %cst_96 = arith.constant dense<0.000000e+00> : vector<2x100xf32>
    %124 = tpu.matmul %122, %123, %cst_96 {dimension_numbers = #tpu.dot_dimension_numbers<[1], [0], [0], [1], [0, 0, 1, 1], [], []>} : vector<2x2xf32>, vector<2x100xf32>, vector<2x100xf32> -> vector<2x100xf32>
    %125 = arith.addf %120, %124 : vector<2x100xf32>
    %c5_97 = arith.constant 5 : index
    %c0_98 = arith.constant 0 : index
    %c0_99 = arith.constant 0 : index
    %126 = vector.load %arg2[%c5_97, %c0_98, %c0_99] : memref<9x2x2xf32, #tpu.memory_space<vmem>>, vector<1x2x2xf32>
    %127 = vector.shape_cast %126 : vector<1x2x2xf32> to vector<2x2xf32>
    %128 = vector.extract_strided_slice %6 {offsets = [0, 12], sizes = [2, 100], strides = [1, 1]} : vector<2x128xf32> to vector<2x100xf32>
    %cst_100 = arith.constant dense<0.000000e+00> : vector<2x100xf32>
    %129 = tpu.matmul %127, %128, %cst_100 {dimension_numbers = #tpu.dot_dimension_numbers<[1], [0], [0], [1], [0, 0, 1, 1], [], []>} : vector<2x2xf32>, vector<2x100xf32>, vector<2x100xf32> -> vector<2x100xf32>
    %130 = arith.addf %125, %129 : vector<2x100xf32>
    %c6_101 = arith.constant 6 : index
    %c0_102 = arith.constant 0 : index
    %c0_103 = arith.constant 0 : index
    %131 = vector.load %arg2[%c6_101, %c0_102, %c0_103] : memref<9x2x2xf32, #tpu.memory_space<vmem>>, vector<1x2x2xf32>
    %132 = vector.shape_cast %131 : vector<1x2x2xf32> to vector<2x2xf32>
    %133 = vector.extract_strided_slice %6 {offsets = [0, 20], sizes = [2, 100], strides = [1, 1]} : vector<2x128xf32> to vector<2x100xf32>
    %cst_104 = arith.constant dense<0.000000e+00> : vector<2x100xf32>
    %134 = tpu.matmul %132, %133, %cst_104 {dimension_numbers = #tpu.dot_dimension_numbers<[1], [0], [0], [1], [0, 0, 1, 1], [], []>} : vector<2x2xf32>, vector<2x100xf32>, vector<2x100xf32> -> vector<2x100xf32>
    %135 = arith.addf %130, %134 : vector<2x100xf32>
    %c7_105 = arith.constant 7 : index
    %c0_106 = arith.constant 0 : index
    %c0_107 = arith.constant 0 : index
    %136 = vector.load %arg2[%c7_105, %c0_106, %c0_107] : memref<9x2x2xf32, #tpu.memory_space<vmem>>, vector<1x2x2xf32>
    %137 = vector.shape_cast %136 : vector<1x2x2xf32> to vector<2x2xf32>
    %138 = vector.extract_strided_slice %6 {offsets = [0, 21], sizes = [2, 100], strides = [1, 1]} : vector<2x128xf32> to vector<2x100xf32>
    %cst_108 = arith.constant dense<0.000000e+00> : vector<2x100xf32>
    %139 = tpu.matmul %137, %138, %cst_108 {dimension_numbers = #tpu.dot_dimension_numbers<[1], [0], [0], [1], [0, 0, 1, 1], [], []>} : vector<2x2xf32>, vector<2x100xf32>, vector<2x100xf32> -> vector<2x100xf32>
    %140 = arith.addf %135, %139 : vector<2x100xf32>
    %c8_109 = arith.constant 8 : index
    %c0_110 = arith.constant 0 : index
    %c0_111 = arith.constant 0 : index
    %141 = vector.load %arg2[%c8_109, %c0_110, %c0_111] : memref<9x2x2xf32, #tpu.memory_space<vmem>>, vector<1x2x2xf32>
    %142 = vector.shape_cast %141 : vector<1x2x2xf32> to vector<2x2xf32>
    %143 = vector.extract_strided_slice %6 {offsets = [0, 22], sizes = [2, 100], strides = [1, 1]} : vector<2x128xf32> to vector<2x100xf32>
    %cst_112 = arith.constant dense<0.000000e+00> : vector<2x100xf32>
    %144 = tpu.matmul %142, %143, %cst_112 {dimension_numbers = #tpu.dot_dimension_numbers<[1], [0], [0], [1], [0, 0, 1, 1], [], []>} : vector<2x2xf32>, vector<2x100xf32>, vector<2x100xf32> -> vector<2x100xf32>
    %145 = arith.addf %140, %144 : vector<2x100xf32>
    %c0_113 = arith.constant 0 : index
    %c0_114 = arith.constant 0 : index
    %c0_115 = arith.constant 0 : index
    %146 = vector.load %arg4[%c0_113, %c0_114, %c0_115] : memref<9x2x2xf32, #tpu.memory_space<vmem>>, vector<1x2x2xf32>
    %147 = vector.shape_cast %146 : vector<1x2x2xf32> to vector<2x2xf32>
    %148 = vector.extract_strided_slice %3 {offsets = [0, 0], sizes = [2, 100], strides = [1, 1]} : vector<2x128xf32> to vector<2x100xf32>
    %cst_116 = arith.constant dense<0.000000e+00> : vector<2x100xf32>
    %149 = tpu.matmul %147, %148, %cst_116 {dimension_numbers = #tpu.dot_dimension_numbers<[1], [0], [0], [1], [0, 0, 1, 1], [], []>} : vector<2x2xf32>, vector<2x100xf32>, vector<2x100xf32> -> vector<2x100xf32>
    %c1_117 = arith.constant 1 : index
    %c0_118 = arith.constant 0 : index
    %c0_119 = arith.constant 0 : index
    %150 = vector.load %arg4[%c1_117, %c0_118, %c0_119] : memref<9x2x2xf32, #tpu.memory_space<vmem>>, vector<1x2x2xf32>
    %151 = vector.shape_cast %150 : vector<1x2x2xf32> to vector<2x2xf32>
    %152 = vector.extract_strided_slice %3 {offsets = [0, 1], sizes = [2, 100], strides = [1, 1]} : vector<2x128xf32> to vector<2x100xf32>
    %cst_120 = arith.constant dense<0.000000e+00> : vector<2x100xf32>
    %153 = tpu.matmul %151, %152, %cst_120 {dimension_numbers = #tpu.dot_dimension_numbers<[1], [0], [0], [1], [0, 0, 1, 1], [], []>} : vector<2x2xf32>, vector<2x100xf32>, vector<2x100xf32> -> vector<2x100xf32>
    %154 = arith.addf %149, %153 : vector<2x100xf32>
    %c2_121 = arith.constant 2 : index
    %c0_122 = arith.constant 0 : index
    %c0_123 = arith.constant 0 : index
    %155 = vector.load %arg4[%c2_121, %c0_122, %c0_123] : memref<9x2x2xf32, #tpu.memory_space<vmem>>, vector<1x2x2xf32>
    %156 = vector.shape_cast %155 : vector<1x2x2xf32> to vector<2x2xf32>
    %157 = vector.extract_strided_slice %3 {offsets = [0, 2], sizes = [2, 100], strides = [1, 1]} : vector<2x128xf32> to vector<2x100xf32>
    %cst_124 = arith.constant dense<0.000000e+00> : vector<2x100xf32>
    %158 = tpu.matmul %156, %157, %cst_124 {dimension_numbers = #tpu.dot_dimension_numbers<[1], [0], [0], [1], [0, 0, 1, 1], [], []>} : vector<2x2xf32>, vector<2x100xf32>, vector<2x100xf32> -> vector<2x100xf32>
    %159 = arith.addf %154, %158 : vector<2x100xf32>
    %c3_125 = arith.constant 3 : index
    %c0_126 = arith.constant 0 : index
    %c0_127 = arith.constant 0 : index
    %160 = vector.load %arg4[%c3_125, %c0_126, %c0_127] : memref<9x2x2xf32, #tpu.memory_space<vmem>>, vector<1x2x2xf32>
    %161 = vector.shape_cast %160 : vector<1x2x2xf32> to vector<2x2xf32>
    %162 = vector.extract_strided_slice %3 {offsets = [0, 10], sizes = [2, 100], strides = [1, 1]} : vector<2x128xf32> to vector<2x100xf32>
    %cst_128 = arith.constant dense<0.000000e+00> : vector<2x100xf32>
    %163 = tpu.matmul %161, %162, %cst_128 {dimension_numbers = #tpu.dot_dimension_numbers<[1], [0], [0], [1], [0, 0, 1, 1], [], []>} : vector<2x2xf32>, vector<2x100xf32>, vector<2x100xf32> -> vector<2x100xf32>
    %164 = arith.addf %159, %163 : vector<2x100xf32>
    %c4_129 = arith.constant 4 : index
    %c0_130 = arith.constant 0 : index
    %c0_131 = arith.constant 0 : index
    %165 = vector.load %arg4[%c4_129, %c0_130, %c0_131] : memref<9x2x2xf32, #tpu.memory_space<vmem>>, vector<1x2x2xf32>
    %166 = vector.shape_cast %165 : vector<1x2x2xf32> to vector<2x2xf32>
    %167 = vector.extract_strided_slice %3 {offsets = [0, 11], sizes = [2, 100], strides = [1, 1]} : vector<2x128xf32> to vector<2x100xf32>
    %cst_132 = arith.constant dense<0.000000e+00> : vector<2x100xf32>
    %168 = tpu.matmul %166, %167, %cst_132 {dimension_numbers = #tpu.dot_dimension_numbers<[1], [0], [0], [1], [0, 0, 1, 1], [], []>} : vector<2x2xf32>, vector<2x100xf32>, vector<2x100xf32> -> vector<2x100xf32>
    %169 = arith.addf %164, %168 : vector<2x100xf32>
    %c5_133 = arith.constant 5 : index
    %c0_134 = arith.constant 0 : index
    %c0_135 = arith.constant 0 : index
    %170 = vector.load %arg4[%c5_133, %c0_134, %c0_135] : memref<9x2x2xf32, #tpu.memory_space<vmem>>, vector<1x2x2xf32>
    %171 = vector.shape_cast %170 : vector<1x2x2xf32> to vector<2x2xf32>
    %172 = vector.extract_strided_slice %3 {offsets = [0, 12], sizes = [2, 100], strides = [1, 1]} : vector<2x128xf32> to vector<2x100xf32>
    %cst_136 = arith.constant dense<0.000000e+00> : vector<2x100xf32>
    %173 = tpu.matmul %171, %172, %cst_136 {dimension_numbers = #tpu.dot_dimension_numbers<[1], [0], [0], [1], [0, 0, 1, 1], [], []>} : vector<2x2xf32>, vector<2x100xf32>, vector<2x100xf32> -> vector<2x100xf32>
    %174 = arith.addf %169, %173 : vector<2x100xf32>
    %c6_137 = arith.constant 6 : index
    %c0_138 = arith.constant 0 : index
    %c0_139 = arith.constant 0 : index
    %175 = vector.load %arg4[%c6_137, %c0_138, %c0_139] : memref<9x2x2xf32, #tpu.memory_space<vmem>>, vector<1x2x2xf32>
    %176 = vector.shape_cast %175 : vector<1x2x2xf32> to vector<2x2xf32>
    %177 = vector.extract_strided_slice %3 {offsets = [0, 20], sizes = [2, 100], strides = [1, 1]} : vector<2x128xf32> to vector<2x100xf32>
    %cst_140 = arith.constant dense<0.000000e+00> : vector<2x100xf32>
    %178 = tpu.matmul %176, %177, %cst_140 {dimension_numbers = #tpu.dot_dimension_numbers<[1], [0], [0], [1], [0, 0, 1, 1], [], []>} : vector<2x2xf32>, vector<2x100xf32>, vector<2x100xf32> -> vector<2x100xf32>
    %179 = arith.addf %174, %178 : vector<2x100xf32>
    %c7_141 = arith.constant 7 : index
    %c0_142 = arith.constant 0 : index
    %c0_143 = arith.constant 0 : index
    %180 = vector.load %arg4[%c7_141, %c0_142, %c0_143] : memref<9x2x2xf32, #tpu.memory_space<vmem>>, vector<1x2x2xf32>
    %181 = vector.shape_cast %180 : vector<1x2x2xf32> to vector<2x2xf32>
    %182 = vector.extract_strided_slice %3 {offsets = [0, 21], sizes = [2, 100], strides = [1, 1]} : vector<2x128xf32> to vector<2x100xf32>
    %cst_144 = arith.constant dense<0.000000e+00> : vector<2x100xf32>
    %183 = tpu.matmul %181, %182, %cst_144 {dimension_numbers = #tpu.dot_dimension_numbers<[1], [0], [0], [1], [0, 0, 1, 1], [], []>} : vector<2x2xf32>, vector<2x100xf32>, vector<2x100xf32> -> vector<2x100xf32>
    %184 = arith.addf %179, %183 : vector<2x100xf32>
    %c8_145 = arith.constant 8 : index
    %c0_146 = arith.constant 0 : index
    %c0_147 = arith.constant 0 : index
    %185 = vector.load %arg4[%c8_145, %c0_146, %c0_147] : memref<9x2x2xf32, #tpu.memory_space<vmem>>, vector<1x2x2xf32>
    %186 = vector.shape_cast %185 : vector<1x2x2xf32> to vector<2x2xf32>
    %187 = vector.extract_strided_slice %3 {offsets = [0, 22], sizes = [2, 100], strides = [1, 1]} : vector<2x128xf32> to vector<2x100xf32>
    %cst_148 = arith.constant dense<0.000000e+00> : vector<2x100xf32>
    %188 = tpu.matmul %186, %187, %cst_148 {dimension_numbers = #tpu.dot_dimension_numbers<[1], [0], [0], [1], [0, 0, 1, 1], [], []>} : vector<2x2xf32>, vector<2x100xf32>, vector<2x100xf32> -> vector<2x100xf32>
    %189 = arith.addf %184, %188 : vector<2x100xf32>
    %190 = vector.extract_strided_slice %145 {offsets = [0, 0], sizes = [2, 80], strides = [1, 1]} : vector<2x100xf32> to vector<2x80xf32>
    %191 = vector.extract_strided_slice %189 {offsets = [0, 0], sizes = [2, 80], strides = [1, 1]} : vector<2x100xf32> to vector<2x80xf32>
    %192 = arith.addf %190, %191 : vector<2x80xf32>
    %c0_149 = arith.constant 0 : index
    %c0_150 = arith.constant 0 : index
    %c0_151 = arith.constant 0 : index
    %193 = vector.load %arg10[%c0_149, %c0_150, %c0_151] : memref<1x2x80xf32, #tpu.memory_space<vmem>>, vector<1x2x80xf32>
    %194 = vector.shape_cast %193 : vector<1x2x80xf32> to vector<2x80xf32>
    %195 = vector.shape_cast %192 : vector<2x80xf32> to vector<1x2x80xf32>
    tpu.vector_store %arg10[%c0_149, %c0_150, %c0_151], %195 {strides = array<i32>} : memref<1x2x80xf32, #tpu.memory_space<vmem>>, vector<1x2x80xf32>,
    return
  }
  func.func @transform_0(%arg0: i32) -> (i32, i32, i32) {
    %c0_i32 = arith.constant 0 : i32
    %c0_i32_0 = arith.constant 0 : i32
    %c0_i32_1 = arith.constant 0 : i32
    %c0_i32_2 = arith.constant 0 : i32
    return %c0_i32, %c0_i32_0, %c0_i32_1 : i32, i32, i32
  }
  func.func @transform_1(%arg0: i32) -> (i32, i32, i32) {
    %c0_i32 = arith.constant 0 : i32
    %c0_i32_0 = arith.constant 0 : i32
    %c0_i32_1 = arith.constant 0 : i32
    %c0_i32_2 = arith.constant 0 : i32
    return %c0_i32, %c0_i32_0, %c0_i32_1 : i32, i32, i32
  }
  func.func @transform_2(%arg0: i32) -> (i32, i32, i32) {
    %c0_i32 = arith.constant 0 : i32
    %c0_i32_0 = arith.constant 0 : i32
    %c0_i32_1 = arith.constant 0 : i32
    %c0_i32_2 = arith.constant 0 : i32
    return %c0_i32, %c0_i32_0, %c0_i32_1 : i32, i32, i32
  }
  func.func @transform_3(%arg0: i32) -> (i32, i32, i32) {
    %c0_i32 = arith.constant 0 : i32
    %c0_i32_0 = arith.constant 0 : i32
    %c0_i32_1 = arith.constant 0 : i32
    %c0_i32_2 = arith.constant 0 : i32
    return %c0_i32, %c0_i32_0, %c0_i32_1 : i32, i32, i32
  }
  func.func @transform_4(%arg0: i32) -> (i32, i32) {
    %c0_i32 = arith.constant 0 : i32
    %c0_i32_0 = arith.constant 0 : i32
    %c0_i32_1 = arith.constant 0 : i32
    return %c0_i32, %c0_i32_0 : i32, i32
  }
  func.func @transform_5(%arg0: i32) -> (i32, i32) {
    %c0_i32 = arith.constant 0 : i32
    %c0_i32_0 = arith.constant 0 : i32
    %c0_i32_1 = arith.constant 0 : i32
    return %c0_i32, %c0_i32_0 : i32, i32
  }
  func.func @transform_6(%arg0: i32) -> (i32, i32, i32) {
    %c0_i32 = arith.constant 0 : i32
    %c0_i32_0 = arith.constant 0 : i32
    %c0_i32_1 = arith.constant 0 : i32
    return %arg0, %c0_i32, %c0_i32_0 : i32, i32, i32
  }
  func.func @transform_7(%arg0: i32) -> (i32, i32, i32) {
    %c0_i32 = arith.constant 0 : i32
    %c0_i32_0 = arith.constant 0 : i32
    %c0_i32_1 = arith.constant 0 : i32
    return %arg0, %c0_i32, %c0_i32_0 : i32, i32, i32
  }
  func.func @transform_8(%arg0: i32) -> (i32, i32, i32) {
    %c0_i32 = arith.constant 0 : i32
    %c0_i32_0 = arith.constant 0 : i32
    %c0_i32_1 = arith.constant 0 : i32
    return %arg0, %c0_i32, %c0_i32_0 : i32, i32, i32
  }
  func.func @transform_9(%arg0: i32) -> (i32, i32, i32) {
    %c0_i32 = arith.constant 0 : i32
    %c0_i32_0 = arith.constant 0 : i32
    %c0_i32_1 = arith.constant 0 : i32
    return %arg0, %c0_i32, %c0_i32_0 : i32, i32, i32
  }
}

</mosaic_0001>

<bundles_post_ra>
// kernel: tpu_custom_call.1
= control target key start
LH: loop header
LB: loop body
LE: loop exit
PB: predicated region body
PF: predicated region fallthrough
CT: control target
= control target key end

     0   :  { %15 = vsyncpa [#allocation3], 0  ;;  %s6272_s0 = inlined_call_operand.vmem [shape: f32[9,2,2], index: 0, kind: input, shape index: {}]   ;;  %s6273_s1 = inlined_call_operand.vmem [shape: f32[9,2,2], index: 1, kind: input, shape index: {}]   ;;  %s6274_s2 = inlined_call_operand.vmem [shape: f32[9,2,2], index: 2, kind: input, shape index: {}]   ;;  %s6275_s3 = inlined_call_operand.vmem [shape: f32[9,2,2], index: 3, kind: input, shape index: {}]   ;;  %s6276_s4 = inlined_call_operand.vmem [shape: f32[324,128], index: 4, kind: input, shape index: {}]   ;;  %s6277_s5 = inlined_call_operand.vmem [shape: f32[100,288], index: 5, kind: input, shape index: {}]   ;;  %s6278_s6 = inlined_call_operand.vmem [shape: f32[2,2,384], index: 6, kind: input, shape index: {}]   ;;  %s6279_s7 = inlined_call_operand.vmem [shape: f32[2,2,128], index: 7, kind: input, shape index: {}]   ;;  %s6280_s8 = inlined_call_operand.hbm [shape: f32[2,2,288], index: 8, kind: output, shape index: {0}]   ;;  %s6281_s9 = inlined_call_operand.hbm [shape: f32[2,2,80], index: 9, kind: output, shape index: {1}]  }
   0x1   :  { %17 = vsyncpa [#allocation3 + $0x1], 0 }
   0x2   :  { %18 = vsyncpa [#allocation5], 0 }
   0x3   :  { %20 = vsyncpa [#allocation5 + $0x1], 0  ;;  %s5416_s30 = smov 0   ;;  %s5418_s10 = smov 0  }
   0x4   :  { %s5420_s11 = smov 0   ;;  %s5422_s12 = smov 0  }
   0x5 LB: > { %6287 = sst [smem:[#allocation8_spill]] %s5341_s11  ;;  %s5437_s13 = sadd.s32 4294967295, %s5345_s12   ;;  %s5345_s12 = sphi %s5422_s12, %s6293_s12   ;;  %s5341_s11 = sphi %s5420_s11, %s6295_s11   ;;  %s5337_s10 = sphi %s5418_s10, %s6297_s10   ;;  %s5333_s30 = sphi %s5416_s30, %s6296_s30  }
   0x6   : > { %s4503_s14 = sadd.s32 4294967294, %s5345_s12   ;;  %s5441_s15 = sadd.s32 1, %s5345_s12  }
   0x7   : > { %6288 = sst [smem:[#allocation9_spill]] %s5441_s15  ;;  %s211_s16 = sadd.s32 1, %s5341_s11 }
   0x8   : > { %s208_s17 = ssub.s32 %s5345_s12, %s5441_s15  ;;  %p221_p0 = scmp.ne.s32.totalorder %s5341_s11, %s5337_s10 }
   0x9   : > { %p209_p1 = scmp.eq.s32.totalorder %s208_s17, 0  ;;  %p222_p2 = scmp.eq.s32.totalorder %s5437_s13, 1 }
   0xa   : > { %p227_p3 = scmp.ne.s32.totalorder %s5337_s10, %s5333_s30  ;;  %p228_p4 = scmp.eq.s32.totalorder %s4503_s14, 1 }
   0xb   : > { %s5452_s18 = scalar_select %p209_p1, %s5341_s11, %s211_s16  }
   0xc   : > { %p5454_p5 = por %p222_p2, %p221_p0  ;;  %p5458_p6 = por %p228_p4, %p227_p3 }
   0xd   : > { %6289 = sst [smem:[#allocation10_spill]] %s5452_s18  ;;  %p4506_p7 = scmp.ge.s32.totalorder %s5345_s12, 1 }
   0xe   : > { %p305_p8 = scmp.lt.s32.totalorder %s5345_s12, 3 }
  0x10   : > { %p306_p9 = pnand %p4506_p7, %p305_p8 }
  0x11   : > { %v377_v0 = vld [vmem:[%s6276_s4 + $0x80] sm:$0xff] (!%p306_p9)  ;;  %v378_v1 = vld [vmem:[%s6276_s4 + $0x88] sm:$0xff] (!%p306_p9)  ;;  %p350_p10 = scmp.lt.s32.totalorder (!%p306_p9), %s5437_s13, 1  ;;  %v407_v3 = vlaneseq (!%p306_p9)  ;;  %v379_v6 = vld [vmem:[%s6276_s4 + $0x90] sm:$0xff] (!%p306_p9)  ;;  %v5347_v8 = vmov (!%p306_p9), 0.0|0.0   ;;  %vm5349_vm0 = vmmov (!%p306_p9), 0  }
  0x12   : > { %309 = sbr.rel (%p306_p9) target bundleno = 764 (0x2fc), region = 52  ;;  %v361_v2 = vld [vmem:[%s6276_s4] sm:$0xff] (!%p306_p9)  ;;  %v5014_v4 = vpack.c.bf16 (!%p306_p9), %v378_v1, %v377_v0  ;;  %v362_v5 = vld [vmem:[%s6276_s4 + $0x8] sm:$0xff] (!%p306_p9)  ;;  %v380_v7 = vld [vmem:[%s6276_s4 + $0x98] sm:$0xff] (!%p306_p9)  ;;  %5046 = vmatprep.subr.bf16.mxu1 (!%p306_p9), %v5347_v8  ;;  %v5348_v14 = vmov (!%p306_p9), 1983009808  }
  0x13   : > { %v5016_v9 = vpack.c.bf16 (!%p306_p9), %v362_v5, %v361_v2  ;;  %v5018_v10 = vpack.c.bf16 (!%p306_p9), %v380_v7, %v379_v6  ;;  %v363_v11 = vld [vmem:[%s6276_s4 + $0x10] sm:$0xff] (!%p306_p9)  ;;  %v364_v12 = vld [vmem:[%s6276_s4 + $0x18] sm:$0xff] (!%p306_p9)  ;;  %v381_v13 = vld [vmem:[%s6276_s4 + $0xa0] sm:$0xff] (!%p306_p9)  ;;  %v405_v15 = vunpack.c.l.s4 (!%p306_p9), %v5348_v14  ;;  %v408_v16 = vshrl.u32 (!%p306_p9), %v407_v3, 7  ;;  %s5351_s11 = smov (!%p306_p9), 127   ;;  %s5352_s29 = smov (!%p306_p9), 118  }
  0x14   : > { %5015 = vmatprep.subr.bf16.mxu0 (!%p306_p9), %v5014_v4  ;;  %v382_v17 = vld [vmem:[%s6276_s4 + $0xa8] sm:$0xff] (!%p306_p9)  ;;  %v5020_v18 = vpack.c.bf16 (!%p306_p9), %v364_v12, %v363_v11  ;;  %v5350_v20 = vmov (!%p306_p9), 0.0   ;;  %v365_v22 = vld [vmem:[%s6276_s4 + $0x20] sm:$0xff] (!%p306_p9)  ;;  %v383_v24 = vld [vmem:[%s6276_s4 + $0xb0] sm:$0xff] (!%p306_p9)  ;;  %s5353_s28 = smov (!%p306_p9), 126   ;;  %s5355_s21 = smov (!%p306_p9), 116  }
  0x15   : > { %5017 = vmatpush3.bf16.msra.mxu0 (!%p306_p9), %v5016_v9  ;;  %v406_v19 = vunpack.c.0.s8 (!%p306_p9), %v405_v15  ;;  %4802 = vmatprep.mubr.msk.f32.mxu1 (!%p306_p9), %vm5349_vm0, %v5350_v20  ;;  %v5022_v21 = vpack.c.bf16 (!%p306_p9), %v382_v17, %v381_v13  ;;  %v366_v23 = vld [vmem:[%s6276_s4 + $0x28] sm:$0xff] (!%p306_p9)  ;;  %v384_v25 = vld [vmem:[%s6276_s4 + $0xb8] sm:$0xff] (!%p306_p9)  ;;  %v393_v26 = vld [vmem:[%s6276_s4 + $0x100] sm:$0xff] (!%p306_p9)  ;;  %s6285_s15 = smov (!%p306_p9), 108   ;;  %s5357_s17 = smov (!%p306_p9), 107   ;;  %vm424_vm1 = vcmask (!%p306_p9), 1043456  }
  0x16   : > { %5019 = vmatprep.subr.bf16.mxu0 (!%p306_p9), %v5018_v10  ;;  %v394_v28 = vld [vmem:[%s6276_s4 + $0x108] sm:$0xff] (!%p306_p9)  ;;  %v5024_v31 = vpack.c.bf16 (!%p306_p9), %v366_v23, %v365_v22  ;;  %v367_v32 = vld [vmem:[%s6276_s4 + $0x30] sm:$0xff] (!%p306_p9)  ;;  %v5026_v35 = vpack.c.bf16 (!%p306_p9), %v384_v25, %v383_v24  ;;  %v368_v36 = vld [vmem:[%s6276_s4 + $0x38] sm:$0xff] (!%p306_p9)  ;;  %vm421_vm2 = vcmask (!%p306_p9), 556032   ;;  %vm584_vm3 = vcmask (!%p306_p9), 1041408   ;;  %s4650_s23 = sshll.u32 (!%p306_p9), %s5437_s13, 5 }
  0x17   : > { %v5517_v27 = vsub.s32 (!%p306_p9), %v406_v19, %v408_v16  ;;  %v5047_v33 = vpack.c.bf16 (!%p306_p9), %v394_v28, %v393_v26  ;;  %v395_v37 = vld [vmem:[%s6276_s4 + $0x110] sm:$0xff] (!%p306_p9)  ;;  %v396_v38 = vld [vmem:[%s6276_s4 + $0x118] sm:$0xff] (!%p306_p9)  ;;  %v385_v39 = vld [vmem:[%s6276_s4 + $0xc0] sm:$0xff] (!%p306_p9)  ;;  %v5028_v45 = vpack.c.bf16 (!%p306_p9), %v368_v36, %v367_v32  ;;  %vm580_vm4 = vcmask (!%p306_p9), 15360  }
  0x18   : > { %v386_v40 = vld [vmem:[%s6276_s4 + $0xc8] sm:$0xff] (!%p306_p9)  ;;  %v5050_v41 = vpack.c.bf16 (!%p306_p9), %v396_v38, %v395_v37  ;;  %v397_v43 = vld [vmem:[%s6276_s4 + $0x120] sm:$0xff] (!%p306_p9)  ;;  %v387_v49 = vld [vmem:[%s6276_s4 + $0xd0] sm:$0xff] (!%p306_p9)  ;;  %vm577_vm5 = vcmask (!%p306_p9), 1039360   ;;  %vm890_vm6 = vcmask (!%p306_p9), 1031168   ;;  %vm1054_vm7 = vcmask (!%p306_p9), 900096  }
  0x19   : > { %s351_s27 = scalar_select %p350_p10, %s5437_s13, 1  ;;  %5021 = vmatpush3.bf16.msra.mxu0 %v5020_v18  ;;  %5048 = vmatpush3.bf16.msra.mxu1 %v5047_v33  ;;  %v398_v44 = vld [vmem:[%s6276_s4 + $0x128] sm:$0xff]  ;;  %v5030_v46 = vpack.c.bf16 %v386_v40, %v385_v39  ;;  %v369_v47 = vld [vmem:[%s6276_s4 + $0x40] sm:$0xff]  ;;  %v388_v50 = vld [vmem:[%s6276_s4 + $0xd8] sm:$0xff]  ;;  %vm1218_vm8 = vcmask 891904   ;;  %vm1382_vm9 = vcmask 883712  }
  0x1a   : > { %5023 = vmatprep.subr.bf16.mxu0 %v5022_v21  ;;  %5049 = vmatprep.subr.bf16.mxu1 %v5347_v8  ;;  %v370_v48 = vld [vmem:[%s6276_s4 + $0x48] sm:$0xff]  ;;  %v5053_v51 = vpack.c.bf16 %v398_v44, %v397_v43  ;;  %v399_v52 = vld [vmem:[%s6276_s4 + $0x130] sm:$0xff]  ;;  %v400_v53 = vld [vmem:[%s6276_s4 + $0x138] sm:$0xff]  ;;  %v5034_v55 = vpack.c.bf16 %v388_v50, %v387_v49  ;;  %vm1546_vm10 = vcmask 752640   ;;  %vm1710_vm11 = vcmask 744448  }
  0x1b   : > { %s4509_s14 = sshll.u32 %s351_s27, 1  ;;  %s5187_s16 = smul.u32 6, %s351_s27  ;;  %v5032_v54 = vpack.c.bf16 %v370_v48, %v369_v47  ;;  %v371_v56 = vld [vmem:[%s6276_s4 + $0x50] sm:$0xff]  ;;  %v372_v57 = vld [vmem:[%s6276_s4 + $0x58] sm:$0xff]  ;;  %v389_v58 = vld [vmem:[%s6276_s4 + $0xe0] sm:$0xff]  ;;  %v5056_v60 = vpack.c.bf16 %v400_v53, %v399_v52  ;;  %vm1874_vm12 = vcmask 736256  }
  0x1c   : > { %s358_s26 = scalar_lea.vmem %s6279_s7, %s4509_s14  ;;  %s5354_s14 = smov 117   ;;  %v390_v59 = vld [vmem:[%s6276_s4 + $0xe8] sm:$0xff]  ;;  %v5036_v62 = vpack.c.bf16 %v372_v57, %v371_v56  ;;  %v373_v0 = vld [vmem:[%s6276_s4 + $0x60] sm:$0xff]  ;;  %v391_v2 = vld [vmem:[%s6276_s4 + $0xf0] sm:$0xff]  ;;  %vm2785_vm13 = vcmask 818176   ;;  %vm2962_vm14 = vcmask 1043458  }
  0x1d   : > { %s354_s22 = scalar_lea.vmem %s6278_s6, %s5187_s16  ;;  %v5525_v29 = vld [vmem:[%s358_s26] sm:$0x3]  ;;  %5025 = vmatpush3.bf16.msra.mxu0 %v5024_v31  ;;  %5051 = vmatpush3.bf16.msra.mxu1 %v5050_v41  ;;  %v5038_v63 = vpack.c.bf16 %v390_v59, %v389_v58  ;;  %v374_v1 = vld [vmem:[%s6276_s4 + $0x68] sm:$0xff]  ;;  %v392_v3 = vld [vmem:[%s6276_s4 + $0xf8] sm:$0xff]  ;;  %s5359_s16 = smov 110  }
  0x1e   : > { %v5527_v30 = vld [vmem:[%s354_s22] sm:$0x3f]  ;;  %2034 = vrot.lane.b32.xlu0 %v5525_v29, %s5351_s11  ;;  %2268 = vrot.lane.b32.xlu1 %v5525_v29, %s5352_s29  ;;  %v5040_v6 = vpack.c.bf16 %v374_v1, %v373_v0  ;;  %v5042_v7 = vpack.c.bf16 %v392_v3, %v391_v2  ;;  %v375_v9 = vld [vmem:[%s6276_s4 + $0x70] sm:$0xff]  ;;  %vm2963_vm15 = vmor %vm2962_vm14, %vm584_vm3 }
  0x1f   : > { %v5536_v34 = vrot.slane %v5527_v30, %v5517_v27  ;;  %5027 = vmatprep.subr.bf16.mxu0 %v5026_v35  ;;  %5052 = vmatprep.subr.bf16.mxu1 %v5347_v8  ;;  %v403_v61 = vcombine.high %v5527_v30, %v5527_v30  ;;  %v401_v5 = vld [vmem:[%s6276_s4 + $0x140] sm:$0xf]  ;;  %v376_v10 = vld [vmem:[%s6276_s4 + $0x78] sm:$0xff]  ;;  %v4570_v16 = vld [vmem:[%s6274_s2 + $0x4] sm:$0x3] }
  0x20   : > { %v5044_v11 = vpack.c.bf16 %v376_v10, %v375_v9  ;;  %v4565_v12 = vld [vmem:[%s6274_s2 + $0x2] sm:$0x3]  ;;  %v2030_v14 = vld [vmem:[%s6274_s2] sm:$0x3]  ;;  %v4573_v18 = vld [vmem:[%s6274_s2 + $0x6] sm:$0x3] }
  0x21   : > { %v5557_v42 = vcombine.high %v5536_v34, %v5536_v34  ;;  %5029 = vmatpush3.bf16.msra.mxu0 %v5028_v45  ;;  %5054 = vmatpush3.bf16.msra.mxu1 %v5053_v51  ;;  %v5626_v4 = vrot.slane %v403_v61, %v5517_v27  ;;  %v4576_v21 = vld [vmem:[%s6274_s2 + $0x8] sm:$0x3]  ;;  %v4579_v23 = vld [vmem:[%s6274_s2 + $0xa] sm:$0x3]  ;;  %v4582_v25 = vld [vmem:[%s6274_s2 + $0xc] sm:$0x3] }
  0x22   : > { %2188 = vrot.lane.b32.xlu0 %v5525_v29, %s5353_s28  ;;  %2348 = vrot.lane.b32.xlu1 %v5525_v29, %s5354_s14  ;;  %v4585_v28 = vld [vmem:[%s6274_s2 + $0xe] sm:$0x3]  ;;  %v4588_v31 = vld [vmem:[%s6274_s2 + $0x10] sm:$0x3] }
  0x23   : > { %492 = vmatprep.mubr.f32.mxu0 %v5557_v42  ;;  %5031 = vmatprep.subr.bf16.mxu0 %v5030_v46  ;;  %v4596_v41 = vld [vmem:[%s6273_s1 + $0x2] sm:$0x3]  ;;  %v2967_v50 = vld [vmem:[%s6273_s1] sm:$0x3]  ;;  %v4601_v56 = vld [vmem:[%s6273_s1 + $0x4] sm:$0x3] }
  0x24   : > { %5055 = vmatprep.subr.bf16.mxu1 %v5347_v8  ;;  %v4512_v49 = vld [vmem:[%s6272_s0 + $0x2] sm:$0x3]  ;;  %v4523_v61 = vld [vmem:[%s6272_s0 + $0x4] sm:$0x3] }
  0x25   : > { %5033 = vmatpush3.bf16.msra.mxu0 %v5032_v54  ;;  %5057 = vmatpush3.bf16.msra.mxu1 %v5056_v60 }
  0x26   : > { %2428 = vrot.lane.b32.xlu0 %v5525_v29, %s5355_s21  ;;  %2508 = vrot.lane.b32.xlu1 %v5525_v29, %s6285_s15  ;;  %s5358_s15 = smov 106  }
  0x27   : > { %5035 = vmatprep.subr.bf16.mxu0 %v5034_v55  ;;  %4800 = vmatprep.subr.mxu1 %v5350_v20 }
  0x29   : > { %5037 = vmatpush3.bf16.msra.mxu0 %v5036_v62  ;;  %4801 = vmatpush3.msk.msra.mxu1 %vm424_vm1, %v401_v5  ;;  %v4529_v5 = vld [vmem:[%s6272_s0 + $0x6] sm:$0x3] }
  0x2a   : > { %2588 = vrot.lane.b32.xlu0 %v5525_v29, %s5357_s17  ;;  %2668 = vrot.lane.b32.xlu1 %v5525_v29, %s5358_s15 }
  0x2b   : > { %5039 = vmatprep.subr.bf16.mxu0 %v5038_v63  ;;  %4803 = vmatmul.mubr.msk.f32.vlgmr.msra.gmra.mrb[0].mxu1 %vm421_vm2, %v5626_v4  ;;  %v4604_v63 = vld [vmem:[%s6273_s1 + $0x6] sm:$0x3] }
  0x2c   : > { %655 = vmatprep.mubr.f32.mxu1 %v5350_v20 }
  0x2d   : > { %5041 = vmatpush3.bf16.msra.mxu0 %v5040_v6 }
  0x2e   : > { %573 = vrot.lane.b32.xlu1 %v5557_v42, %s5351_s11  ;;  %5043 = vmatprep.subr.bf16.mxu0 %v5042_v7  ;;  %v4607_v7 = vld [vmem:[%s6273_s1 + $0x8] sm:$0x3] }
  0x31   : > { %5045 = vmatpush3.bf16.msra.mxu0 %v5044_v11 }
  0x32   : > { %571 = vrot.lane.b32.xlu1 %v5536_v34, %s5351_s11  ;;  %4850 = vmatprep.subr.mxu0 %v5350_v20 }
  0x34   : > { %493 = vmatmul.mubr.f32.vlgmr.msra.gmra.mrb[0].mxu0 %v5536_v34 }
  0x35   : > { %4852 = vmatprep.mubr.msk.f32.mxu0 %vm5349_vm0, %v5350_v20 }
  0x90   : > { %v5652_v13 = vpop.permute.xlu0 %2034  ;;  %v5677_v17 = vpop.permute.xlu1 %2268 }
  0x91   : > { %4851 = vmatpush3.msk.msra.mxu0 %vm584_vm3, %v5652_v13 }
  0x92   : > { %4853 = vmatmul.mubr.msk.f32.vlgmr.msra.gmra.mrb[2].mxu0 %vm580_vm4, %v4565_v12  ;;  %4855 = vmatprep.subr.mxu0 %v5350_v20 }
  0x93   : > { %4856 = vmatpush3.msk.msra.mxu0 %vm584_vm3, %v5525_v29  ;;  %4857 = vmatprep.mubr.msk.f32.mxu0 %vm5349_vm0, %v5350_v20 }
  0x94   : > { %4860 = vmatprep.subr.mxu0 %v5350_v20  ;;  %v5666_v15 = vpop.permute.xlu0 %2188  ;;  %v5688_v19 = vpop.permute.xlu1 %2348 }
  0x98   : > { %v5699_v22 = vpop.permute.xlu0 %2428  ;;  %v5710_v24 = vpop.permute.xlu1 %2508 }
  0x9a   : > { %4858 = vmatmul.mubr.msk.f32.vlgmr.msra.gmra.mrb[2].mxu0 %vm580_vm4, %v2030_v14 }
  0x9b   : > { %4861 = vmatpush3.msk.msra.mxu0 %vm584_vm3, %v5666_v15  ;;  %4862 = vmatprep.mubr.msk.f32.mxu0 %vm5349_vm0, %v5350_v20 }
  0x9c   : > { %4865 = vmatprep.subr.mxu0 %v5350_v20  ;;  %v5721_v26 = vpop.permute.xlu0 %2588  ;;  %v5732_v30 = vpop.permute.xlu1 %2668 }
  0xa0   : > { %v574_v39 = vpop.permute.xlu1 %573 }
  0xa2   : > { %4863 = vmatmul.mubr.msk.f32.vlgmr.msra.gmra.mrb[2].mxu0 %vm580_vm4, %v4570_v16 }
  0xa3   : > { %4866 = vmatpush3.msk.msra.mxu0 %vm584_vm3, %v5677_v17  ;;  %4867 = vmatprep.mubr.msk.f32.mxu0 %vm5349_vm0, %v5350_v20 }
  0xa4   : > { %4870 = vmatprep.subr.mxu0 %v5350_v20  ;;  %v572_v40 = vpop.permute.xlu1 %571 }
  0xa5   : > { %v578_v45 = vsel %vm577_vm5, %v572_v40, %v574_v39 }
  0xaa   : > { %4868 = vmatmul.mubr.msk.f32.vlgmr.msra.gmra.mrb[2].mxu0 %vm580_vm4, %v4573_v18  ;;  %v4535_v18 = vld [vmem:[%s6272_s0 + $0x8] sm:$0x3] }
  0xab   : > { %4871 = vmatpush3.msk.msra.mxu0 %vm584_vm3, %v5688_v19  ;;  %4872 = vmatprep.mubr.msk.f32.mxu0 %vm5349_vm0, %v5350_v20 }
  0xac   : > { %4875 = vmatprep.subr.mxu0 %v5350_v20 }
  0xb2   : > { %4873 = vmatmul.mubr.msk.f32.vlgmr.msra.gmra.mrb[2].mxu0 %vm580_vm4, %v4576_v21 }
  0xb3   : > { %4876 = vmatpush3.msk.msra.mxu0 %vm584_vm3, %v5699_v22  ;;  %4877 = vmatprep.mubr.msk.f32.mxu0 %vm5349_vm0, %v5350_v20 }
  0xb4   : > { %4880 = vmatprep.subr.mxu0 %v5350_v20 }
  0xba   : > { %4878 = vmatmul.mubr.msk.f32.vlgmr.msra.gmra.mrb[2].mxu0 %vm580_vm4, %v4579_v23  ;;  %v4610_v23 = vld [vmem:[%s6273_s1 + $0xa] sm:$0x3] }
  0xbb   : > { %4881 = vmatpush3.msk.msra.mxu0 %vm584_vm3, %v5710_v24  ;;  %4882 = vmatprep.mubr.msk.f32.mxu0 %vm5349_vm0, %v5350_v20 }
  0xbc   : > { %4885 = vmatprep.subr.mxu0 %v5350_v20 }
  0xc2   : > { %4883 = vmatmul.mubr.msk.f32.vlgmr.msra.gmra.mrb[2].mxu0 %vm580_vm4, %v4582_v25 }
  0xc3   : > { %4886 = vmatpush3.msk.msra.mxu0 %vm584_vm3, %v5721_v26  ;;  %4887 = vmatprep.mubr.msk.f32.mxu0 %vm5349_vm0, %v5350_v20 }
  0xc4   : > { %4890 = vmatprep.subr.mxu0 %v5350_v20 }
  0xca   : > { %4888 = vmatmul.mubr.msk.f32.vlgmr.msra.gmra.mrb[2].mxu0 %vm580_vm4, %v4585_v28 }
  0xcb   : > { %4891 = vmatpush3.msk.msra.mxu0 %vm584_vm3, %v5732_v30  ;;  %4892 = vmatprep.mubr.msk.f32.mxu0 %vm5349_vm0, %v5350_v20 }
  0xcc   : > { %4924 = vmatprep.subr.mxu0 %v5350_v20 }
  0xd2   : > { %4893 = vmatmul.mubr.msk.f32.vlgmr.msra.gmra.mrb[2].mxu0 %vm580_vm4, %v4588_v31 }
  0xd3   : > { %4926 = vmatprep.mubr.msk.f32.mxu0 %vm5349_vm0, %v5350_v20 }
  0xfe   : > { %v564_v32 = vpop.f32.mrb[0].mxu1 }
  0xff   : > { %v4804_v33 = vpop.f32.mrb[1].mxu1 }
 0x100   : > { %v4541_v33 = vld [vmem:[%s6272_s0 + $0xa] sm:$0x3] }
 0x107   : > { %v4685_v35 = vpop.f32.mrb[0].mxu0 }
 0x108   : > { %v4686_v36 = vpop.f32.mrb[1].mxu0 }
 0x109   : > { %v4687_v37 = vadd.f32 %v4686_v36, %v4685_v35 }
 0x10b   : > { %v565_v38 = vadd.f32 %v4687_v37, %v564_v32  ;;  %v4613_v37 = vld [vmem:[%s6273_s1 + $0xc] sm:$0x3] }
 0x10d   : > { %3205 = vrot.lane.b32.xlu1 %v565_v38, %s5352_s29  ;;  %2971 = vrot.lane.b32.xlu0 %v565_v38, %s5351_s11  ;;  %s5360_s29 = smov 109  }
 0x111   : > { %888 = vrot.lane.b32.xlu1 %v5626_v4, %s5353_s28  ;;  %575 = vrot.lane.b32.xlu0 %v5626_v4, %s5351_s11  ;;  %s6292_s11 = smov 108  }
 0x115   : > { %3285 = vrot.lane.b32.xlu1 %v565_v38, %s5354_s14  ;;  %3125 = vrot.lane.b32.xlu0 %v565_v38, %s5353_s28  ;;  %s5361_s14 = smov 92  }
 0x119   : > { %1052 = vrot.lane.b32.xlu1 %v5626_v4, %s5359_s16  ;;  %886 = vrot.lane.b32.xlu0 %v5557_v42, %s5353_s28 }
 0x11d   : > { %3365 = vrot.lane.b32.xlu1 %v565_v38, %s5355_s21  ;;  %884 = vrot.lane.b32.xlu0 %v5536_v34, %s5353_s28  ;;  %s5362_s28 = smov 91   ;;  %s5363_s21 = smov 90  }
 0x121   : > { %1216 = vrot.lane.b32.xlu1 %v5626_v4, %s5360_s29  ;;  %1050 = vrot.lane.b32.xlu0 %v5557_v42, %s5359_s16 }
 0x125   : > { %3445 = vrot.lane.b32.xlu1 %v565_v38, %s6292_s11  ;;  %1048 = vrot.lane.b32.xlu0 %v5536_v34, %s5359_s16 }
 0x129   : > { %1380 = vrot.lane.b32.xlu1 %v5626_v4, %s6292_s11  ;;  %1214 = vrot.lane.b32.xlu0 %v5557_v42, %s5360_s29 }
 0x12d   : > { %3525 = vrot.lane.b32.xlu1 %v565_v38, %s5357_s17  ;;  %1212 = vrot.lane.b32.xlu0 %v5536_v34, %s5360_s29 }
 0x131   : > { %1544 = vrot.lane.b32.xlu1 %v5626_v4, %s5361_s14  ;;  %1378 = vrot.lane.b32.xlu0 %v5557_v42, %s6292_s11 }
 0x135   : > { %3605 = vrot.lane.b32.xlu1 %v565_v38, %s5358_s15  ;;  %1376 = vrot.lane.b32.xlu0 %v5536_v34, %s6292_s11  ;;  %s5188_s15 = smul.u32 96, %s5437_s13  ;;  %s5364_s11 = smov [#allocation2]  }
 0x137   : > { %s6191_s22 = scalar_lea.hbm %s6280_s8, %s5188_s15 }
 0x139   : > { %1542 = vrot.lane.b32.xlu0 %v5557_v42, %s5361_s14  ;;  %1708 = vrot.lane.b32.xlu1 %v5626_v4, %s5362_s28 }
 0x13d   : > { %1540 = vrot.lane.b32.xlu0 %v5536_v34, %s5361_s14  ;;  %1870 = vrot.lane.b32.xlu1 %v5557_v42, %s5363_s21  ;;  %s6180_s14 = sand.u32 1, %s5337_s10  }
 0x13e   : > { %s4368_s16 = scalar_lea.sflag [#allocation3], %s6180_s14 }
 0x141   : > { %1706 = vrot.lane.b32.xlu0 %v5557_v42, %s5362_s28  ;;  %1868 = vrot.lane.b32.xlu1 %v5536_v34, %s5363_s21 }
 0x145   : > { %1704 = vrot.lane.b32.xlu0 %v5536_v34, %s5362_s28  ;;  %s5186_s28 = smul.u32 6, %s6180_s14 }
 0x147   : > { %s342_s17 = scalar_lea.vmem [#allocation2], %s5186_s28  ;;  %s5255_s28 = sshll.u32 %s5364_s11, 4  ;;  %s5256_s28 = int_to_ptr.vmem [resolvable:$false] %s5255_s28 }
 0x148   : > { %s4387_s25 = sshll.u32 %s342_s17, 4  ;;  %s5257_s15 = scalar_lea.vmem %s5256_s28, 192  ;;  %s6193_s25 = int_to_ptr.vmem [resolvable:$true] %s4387_s25 }
 0x149   : > { %1872 = vrot.lane.b32.xlu0 %v5626_v4, %s5363_s21  ;;  %s4507_s21 = sshll.u32 %s6180_s14, 1  ;;  %s5251_s29 = scalar_lea.vmem %s6193_s25, 96 }
 0x14a   : > { %s6196_s18 = scalar_lea.vmem [#allocation4], %s4507_s21  ;;  %p5252_p11 = scmp.ne.s32.totalorder %s6193_s25, %s5251_s29 }
 0x14b   : > { %s4400_s24 = sshll.u32 %s6196_s18, 4  ;;  %p5258_p0 = scmp.lt.s32.totalorder %s6193_s25, %s5256_s28  ;;  %s6230_s24 = int_to_ptr.vmem [resolvable:$true] %s4400_s24 }
 0x14c   : > { %p5253_p12 = pnand %p5252_p11, %p5454_p5  ;;  %p5259_p1 = scmp.lt.s32.totalorder %s5257_s15, %s5251_s29 }
 0x14e   : > { %p5254_p13 = pneg %p5253_p12  ;;  %p5260_p2 = por %p5259_p1, %p5258_p0 }
 0x150   : > { %p5261_p3 = pnand %p5260_p2, %p5254_p13 }
 0x17f   : > { %v3206_v43 = vpop.permute.xlu1 %3205  ;;  %v2972_v44 = vpop.permute.xlu0 %2971 }
 0x180   : > { %4925 = vmatpush3.msk.msra.mxu0 %vm584_vm3, %v2972_v44  ;;  %v4616_v44 = vld [vmem:[%s6273_s1 + $0xe] sm:$0x3] }
 0x181   : > { %4927 = vmatmul.mubr.msk.f32.vlgmr.msra.gmra.mrb[4].mxu0 %vm580_vm4, %v4596_v41  ;;  %4929 = vmatprep.subr.mxu0 %v5350_v20 }
 0x182   : > { %4930 = vmatpush3.msk.msra.mxu0 %vm584_vm3, %v565_v38  ;;  %4931 = vmatprep.mubr.msk.f32.mxu0 %vm5349_vm0, %v5350_v20 }
 0x183   : > { %v889_v46 = vpop.permute.xlu1 %888  ;;  %v576_v47 = vpop.permute.xlu0 %575  ;;  %4934 = vmatprep.subr.mxu0 %v5350_v20 }
 0x184   : > { %v579_v48 = vsel %vm577_vm5, %v574_v39, %v576_v47 }
 0x185   : > { %4513 = vmatprep.subr.msk.mxu1 %vm584_vm3, %v579_v48 }
 0x186   : > { %4514 = vmatpush1.msk.msra.mxu1 %vm584_vm3, %v578_v45 }
 0x187   : > { %v3286_v51 = vpop.permute.xlu1 %3285  ;;  %4515 = vmatmul.mubr.msk.f32.vlgmr.msra.gmra.mrb[2].mxu1 %vm580_vm4, %v4512_v49  ;;  %4805 = vmatprep.subr.mxu1 %v5350_v20  ;;  %v3126_v52 = vpop.permute.xlu0 %3125 }
 0x188   : > { %4806 = vmatpush3.msk.msra.mxu1 %vm584_vm3, %v576_v47  ;;  %4807 = vmatprep.mubr.msk.f32.mxu1 %vm5349_vm0, %v5350_v20 }
 0x189   : > { %4932 = vmatmul.mubr.msk.f32.vlgmr.msra.gmra.mrb[4].mxu0 %vm580_vm4, %v2967_v50  ;;  %4518 = vmatprep.subr.msk.mxu1 %vm584_vm3, %v5557_v42  ;;  %v568_v42 = vld [vmem:[%s6272_s0] sm:$0x3]  ;;  %v4553_v50 = vld [vmem:[%s6272_s0 + $0xe] sm:$0x3] }
 0x18a   : > { %4935 = vmatpush3.msk.msra.mxu0 %vm584_vm3, %v3126_v52  ;;  %4936 = vmatprep.mubr.msk.f32.mxu0 %vm5349_vm0, %v5350_v20 }
 0x18b   : > { %v1053_v53 = vpop.permute.xlu1 %1052  ;;  %4808 = vmatmul.mubr.msk.f32.vlgmr.msra.gmra.mrb[4].mxu1 %vm580_vm4, %v4512_v49  ;;  %4939 = vmatprep.subr.mxu0 %v5350_v20  ;;  %v887_v54 = vpop.permute.xlu0 %886 }
 0x18c   : > { %4519 = vmatpush1.msk.msra.mxu1 %vm584_vm3, %v5536_v34  ;;  %805 = vmatprep.mubr.f32.mxu1 %v5350_v20  ;;  %v892_v55 = vsel %vm890_vm6, %v887_v54, %v889_v46 }
 0x18d   : > { %4810 = vmatprep.subr.mxu1 %v5350_v20 }
 0x18f   : > { %v3366_v57 = vpop.permute.xlu1 %3365  ;;  %4520 = vmatmul.mubr.msk.f32.vlgmr.msra.gmra.mrb[2].mxu1 %vm580_vm4, %v568_v42  ;;  %v885_v58 = vpop.permute.xlu0 %884 }
 0x190   : > { %4811 = vmatpush3.msk.msra.mxu1 %vm584_vm3, %v5626_v4  ;;  %4812 = vmatprep.mubr.msk.f32.mxu1 %vm5349_vm0, %v5350_v20  ;;  %v891_v34 = vsel %vm890_vm6, %v885_v58, %v887_v54  ;;  %v2749_v58 = vld [vmem:[%s6277_s5 + $0x18] sm:$0xff] }
 0x191   : > { %4937 = vmatmul.mubr.msk.f32.vlgmr.msra.gmra.mrb[4].mxu0 %vm580_vm4, %v4601_v56  ;;  %4524 = vmatprep.subr.msk.mxu1 %vm584_vm3, %v892_v55  ;;  %v2750_v55 = vld [vmem:[%s6277_s5 + $0x20] sm:$0xff] }
 0x192   : > { %4940 = vmatpush3.msk.msra.mxu0 %vm584_vm3, %v3206_v43  ;;  %4941 = vmatprep.mubr.msk.f32.mxu0 %vm5349_vm0, %v5350_v20  ;;  %v4547_v43 = vld [vmem:[%s6272_s0 + $0xc] sm:$0x3] }
 0x193   : > { %v1217_v59 = vpop.permute.xlu1 %1216  ;;  %4813 = vmatmul.mubr.msk.f32.vlgmr.msra.gmra.mrb[4].mxu1 %vm580_vm4, %v568_v42  ;;  %4944 = vmatprep.subr.mxu0 %v5350_v20  ;;  %v1051_v60 = vpop.permute.xlu0 %1050  ;;  %v2747_v42 = vld [vmem:[%s6277_s5 + $0x8] sm:$0xff] }
 0x194   : > { %4525 = vmatpush1.msk.msra.mxu1 %vm584_vm3, %v891_v34  ;;  %966 = vmatprep.mubr.f32.mxu1 %v5350_v20  ;;  %v1056_v62 = vsel %vm1054_vm7, %v1051_v60, %v1053_v53  ;;  %v5058_v56 = vpack.c.bf16 %v2750_v55, %v2747_v42  ;;  %v4622_v34 = vld [vmem:[%s6275_s3 + $0x2] sm:$0x3]  ;;  %v2772_v42 = vld [vmem:[%s6277_s5 + $0xd0] sm:$0xff]  ;;  %v2775_v55 = vld [vmem:[%s6277_s5 + $0xe8] sm:$0xff] }
 0x195   : > { %4815 = vmatprep.subr.mxu1 %v5350_v20 }
 0x197   : > { %v3446_v0 = vpop.permute.xlu1 %3445  ;;  %4526 = vmatmul.mubr.msk.f32.vlgmr.msra.gmra.mrb[2].mxu1 %vm580_vm4, %v4523_v61  ;;  %v1049_v1 = vpop.permute.xlu0 %1048 }
 0x198   : > { %4816 = vmatpush3.msk.msra.mxu1 %vm584_vm3, %v889_v46  ;;  %4817 = vmatprep.mubr.msk.f32.mxu1 %vm5349_vm0, %v5350_v20  ;;  %v1055_v2 = vsel %vm1054_vm7, %v1049_v1, %v1051_v60  ;;  %v2756_v60 = vld [vmem:[%s6277_s5 + $0x50] sm:$0xff]  ;;  %v2759_v1 = vld [vmem:[%s6277_s5 + $0x68] sm:$0xff] }
 0x199   : > { %4942 = vmatmul.mubr.msk.f32.vlgmr.msra.gmra.mrb[4].mxu0 %vm580_vm4, %v4604_v63  ;;  %4530 = vmatprep.subr.msk.mxu1 %vm584_vm3, %v1056_v62  ;;  %v2752_v63 = vld [vmem:[%s6277_s5 + $0x30] sm:$0xff] }
 0x19a   : > { %4945 = vmatpush3.msk.msra.mxu0 %vm584_vm3, %v3286_v51  ;;  %4946 = vmatprep.mubr.msk.f32.mxu0 %vm5349_vm0, %v5350_v20  ;;  %v4619_v51 = vld [vmem:[%s6273_s1 + $0x10] sm:$0x3] }
 0x19b   : > { %4818 = vmatmul.mubr.msk.f32.vlgmr.msra.gmra.mrb[4].mxu1 %vm580_vm4, %v4523_v61  ;;  %4949 = vmatprep.subr.mxu0 %v5350_v20  ;;  %v1215_v3 = vpop.permute.xlu0 %1214  ;;  %v1381_v4 = vpop.permute.xlu1 %1380 }
 0x19c   : > { %4531 = vmatpush1.msk.msra.mxu1 %vm584_vm3, %v1055_v2  ;;  %1130 = vmatprep.mubr.f32.mxu1 %v5350_v20  ;;  %v1220_v6 = vsel %vm1218_vm8, %v1215_v3, %v1217_v59  ;;  %v2762_v2 = vld [vmem:[%s6277_s5 + $0x80] sm:$0xff] }
 0x19d   : > { %4820 = vmatprep.subr.mxu1 %v5350_v20 }
 0x19f   : > { %4532 = vmatmul.mubr.msk.f32.vlgmr.msra.gmra.mrb[2].mxu1 %vm580_vm4, %v4529_v5  ;;  %v1213_v9 = vpop.permute.xlu0 %1212  ;;  %v3526_v14 = vpop.permute.xlu1 %3525 }
 0x1a0   : > { %4821 = vmatpush3.msk.msra.mxu1 %vm584_vm3, %v1053_v53  ;;  %4822 = vmatprep.mubr.msk.f32.mxu1 %vm5349_vm0, %v5350_v20  ;;  %v1219_v11 = vsel %vm1218_vm8, %v1213_v9, %v1215_v3  ;;  %v2768_v9 = vld [vmem:[%s6277_s5 + $0xb0] sm:$0xff] }
 0x1a1   : > { %4947 = vmatmul.mubr.msk.f32.vlgmr.msra.gmra.mrb[4].mxu0 %vm580_vm4, %v4607_v7  ;;  %4536 = vmatprep.subr.msk.mxu1 %vm584_vm3, %v1220_v6  ;;  %v3683_v6 = vld [vmem:[%s6275_s3] sm:$0x3]  ;;  %v2765_v7 = vld [vmem:[%s6277_s5 + $0x98] sm:$0xff] }
 0x1a2   : > { %4950 = vmatpush3.msk.msra.mxu0 %vm584_vm3, %v3366_v57  ;;  %4951 = vmatprep.mubr.msk.f32.mxu0 %vm5349_vm0, %v5350_v20  ;;  %v2746_v57 = vld [vmem:[%s6277_s5] sm:$0xff] }
 0x1a3   : > { %4823 = vmatmul.mubr.msk.f32.vlgmr.msra.gmra.mrb[4].mxu1 %vm580_vm4, %v4529_v5  ;;  %4954 = vmatprep.subr.mxu0 %v5350_v20  ;;  %v1379_v16 = vpop.permute.xlu0 %1378  ;;  %v1545_v28 = vpop.permute.xlu1 %1544  ;;  %v5060_v61 = vpack.c.bf16 %v2749_v58, %v2746_v57  ;;  %v2761_v5 = vld [vmem:[%s6277_s5 + $0x78] sm:$0xff] }
 0x1a4   : > { %4537 = vmatpush1.msk.msra.mxu1 %vm584_vm3, %v1219_v11  ;;  %1294 = vmatprep.mubr.f32.mxu1 %v5350_v20  ;;  %v1384_v21 = vsel %vm1382_vm9, %v1379_v16, %v1381_v4  ;;  %v2781_v57 = vld [vmem:[%s6277_s5 + $0x118] sm:$0xff] }
 0x1a5   : > { %v5869_v10 = vpop.f32.mrb[2].mxu0  ;;  %4825 = vmatprep.subr.mxu1 %v5350_v20 }
 0x1a6   : > { %v4894_v12 = vpop.f32.mrb[3].mxu0 }
 0x1a7   : > { %4538 = vmatmul.mubr.msk.f32.vlgmr.msra.gmra.mrb[2].mxu1 %vm580_vm4, %v4535_v18  ;;  %v1377_v25 = vpop.permute.xlu0 %1376  ;;  %v3606_v35 = vpop.permute.xlu1 %3605  ;;  %v5070_v12 = vpack.c.bf16 %v2768_v9, %v2765_v7 }
 0x1a8   : > { %4826 = vmatpush3.msk.msra.mxu1 %vm584_vm3, %v1217_v59  ;;  %4827 = vmatprep.mubr.msk.f32.mxu1 %vm5349_vm0, %v5350_v20  ;;  %v1383_v31 = vsel %vm1382_vm9, %v1377_v25, %v1379_v16  ;;  %v2753_v59 = vld [vmem:[%s6277_s5 + $0x38] sm:$0xff]  ;;  %v2767_v16 = vld [vmem:[%s6277_s5 + $0xa8] sm:$0xff] }
 0x1a9   : > { %4952 = vmatmul.mubr.msk.f32.vlgmr.msra.gmra.mrb[4].mxu0 %vm580_vm4, %v4610_v23  ;;  %4542 = vmatprep.subr.msk.mxu1 %vm584_vm3, %v1384_v21  ;;  %v5062_v62 = vpack.c.bf16 %v2756_v60, %v2753_v59  ;;  %v2774_v21 = vld [vmem:[%s6277_s5 + $0xe0] sm:$0xff] }
 0x1aa   : > { %4955 = vmatpush3.msk.msra.mxu0 %vm584_vm3, %v3446_v0  ;;  %4956 = vmatprep.mubr.msk.f32.mxu0 %vm5349_vm0, %v5350_v20  ;;  %v2755_v0 = vld [vmem:[%s6277_s5 + $0x48] sm:$0xff] }
 0x1ab   : > { %4828 = vmatmul.mubr.msk.f32.vlgmr.msra.gmra.mrb[4].mxu1 %vm580_vm4, %v4535_v18  ;;  %4959 = vmatprep.subr.mxu0 %v5350_v20  ;;  %v1543_v32 = vpop.permute.xlu0 %1542  ;;  %v1709_v40 = vpop.permute.xlu1 %1708  ;;  %v5064_v3 = vpack.c.bf16 %v2755_v0, %v2752_v63  ;;  %v2771_v18 = vld [vmem:[%s6277_s5 + $0xc8] sm:$0xff] }
 0x1ac   : > { %4543 = vmatpush1.msk.msra.mxu1 %vm584_vm3, %v1383_v31  ;;  %1458 = vmatprep.mubr.f32.mxu1 %v5350_v20  ;;  %v1548_v36 = vsel %vm1546_vm10, %v1543_v32, %v1545_v28  ;;  %v5074_v25 = vpack.c.bf16 %v2774_v21, %v2771_v18  ;;  %v4627_v31 = vld [vmem:[%s6275_s3 + $0x4] sm:$0x3] }
 0x1ad   : > { %4830 = vmatprep.subr.mxu1 %v5350_v20 }
 0x1af   : > { %4544 = vmatmul.mubr.msk.f32.vlgmr.msra.gmra.mrb[2].mxu1 %vm580_vm4, %v4541_v33  ;;  %v1541_v38 = vpop.permute.xlu0 %1540  ;;  %v1871_v47 = vpop.permute.xlu1 %1870 }
 0x1b0   : > { %4831 = vmatpush3.msk.msra.mxu1 %vm584_vm3, %v1381_v4  ;;  %4832 = vmatprep.mubr.msk.f32.mxu1 %vm5349_vm0, %v5350_v20  ;;  %v1547_v39 = vsel %vm1546_vm10, %v1541_v38, %v1543_v32  ;;  %v2758_v4 = vld [vmem:[%s6277_s5 + $0x60] sm:$0xff]  ;;  %v2777_v32 = vld [vmem:[%s6277_s5 + $0xf8] sm:$0xff]  ;;  %v2779_v38 = vld [vmem:[%s6277_s5 + $0x108] sm:$0xff] }
 0x1b1   : > { %4957 = vmatmul.mubr.msk.f32.vlgmr.msra.gmra.mrb[4].mxu0 %vm580_vm4, %v4613_v37  ;;  %4548 = vmatprep.subr.msk.mxu1 %vm584_vm3, %v1548_v36  ;;  %v5068_v11 = vpack.c.bf16 %v2761_v5, %v2758_v4  ;;  %v2776_v37 = vld [vmem:[%s6277_s5 + $0xf0] sm:$0xff] }
 0x1b2   : > { %4960 = vmatpush3.msk.msra.mxu0 %vm584_vm3, %v3526_v14  ;;  %4961 = vmatprep.mubr.msk.f32.mxu0 %vm5349_vm0, %v5350_v20  ;;  %v2764_v14 = vld [vmem:[%s6277_s5 + $0x90] sm:$0xff] }
 0x1b3   : > { %4833 = vmatmul.mubr.msk.f32.vlgmr.msra.gmra.mrb[4].mxu1 %vm580_vm4, %v4541_v33  ;;  %4964 = vmatprep.subr.mxu0 %v5350_v20  ;;  %v1707_v41 = vpop.permute.xlu0 %1706  ;;  %v1869_v53 = vpop.permute.xlu1 %1868  ;;  %v5072_v23 = vpack.c.bf16 %v2767_v16, %v2764_v14  ;;  %v2780_v33 = vld [vmem:[%s6277_s5 + $0x110] sm:$0xff] }
 0x1b4   : > { %4549 = vmatpush1.msk.msra.mxu1 %vm584_vm3, %v1547_v39  ;;  %1622 = vmatprep.mubr.f32.mxu1 %v5350_v20  ;;  %v1712_v45 = vsel %vm1710_vm11, %v1707_v41, %v1709_v40  ;;  %v1875_v54 = vsel %vm1874_vm12, %v1869_v53, %v1871_v47  ;;  %v5078_v36 = vpack.c.bf16 %v2780_v33, %v2777_v32  ;;  %v2769_v53 = vld [vmem:[%s6277_s5 + $0xb8] sm:$0xff] }
 0x1b5   : > { %4835 = vmatprep.subr.mxu1 %v5350_v20  ;;  %v5080_v39 = vpack.c.bf16 %v2779_v38, %v2776_v37 }
 0x1b7   : > { %4550 = vmatmul.mubr.msk.f32.vlgmr.msra.gmra.mrb[2].mxu1 %vm580_vm4, %v4547_v43  ;;  %v1705_v46 = vpop.permute.xlu0 %1704 }
 0x1b8   : > { %4836 = vmatpush3.msk.msra.mxu1 %vm584_vm3, %v1545_v28  ;;  %4837 = vmatprep.mubr.msk.f32.mxu1 %vm5349_vm0, %v5350_v20  ;;  %v1711_v48 = vsel %vm1710_vm11, %v1705_v46, %v1707_v41  ;;  %v2773_v28 = vld [vmem:[%s6277_s5 + $0xd8] sm:$0xff]  ;;  %v2783_v41 = vld [vmem:[%s6277_s5 + $0x128] sm:$0xf]  ;;  %v2754_v46 = vld [vmem:[%s6277_s5 + $0x40] sm:$0xff] }
 0x1b9   : > { %4962 = vmatmul.mubr.msk.f32.vlgmr.msra.gmra.mrb[4].mxu0 %vm580_vm4, %v4616_v44  ;;  %4554 = vmatprep.subr.msk.mxu1 %vm584_vm3, %v1712_v45  ;;  %v2782_v44 = vld [vmem:[%s6277_s5 + $0x120] sm:$0xf] }
 0x1ba   : > { %4965 = vmatpush3.msk.msra.mxu0 %vm584_vm3, %v3606_v35  ;;  %4966 = vmatprep.mubr.msk.f32.mxu0 %vm5349_vm0, %v5350_v20 }
 0x1bb   : > { %4838 = vmatmul.mubr.msk.f32.vlgmr.msra.gmra.mrb[4].mxu1 %vm580_vm4, %v4547_v43  ;;  %4969 = vmatprep.subr.mxu0 %v5350_v20  ;;  %v1873_v49 = vpop.permute.xlu0 %1872  ;;  %v2751_v43 = vld [vmem:[%s6277_s5 + $0x28] sm:$0xff] }
 0x1bc   : > { %4555 = vmatpush1.msk.msra.mxu1 %vm584_vm3, %v1711_v48  ;;  %1786 = vmatprep.mubr.f32.mxu1 %v5350_v20  ;;  %v1876_v52 = vsel %vm1874_vm12, %v1871_v47, %v1873_v49  ;;  %v2757_v47 = vld [vmem:[%s6277_s5 + $0x58] sm:$0xff]  ;;  %v4633_v48 = vld [vmem:[%s6275_s3 + $0x8] sm:$0x3] }
 0x1bd   : > { %4840 = vmatprep.subr.mxu1 %v5350_v20 }
 0x1bf   : > { %4556 = vmatmul.mubr.msk.f32.vlgmr.msra.gmra.mrb[2].mxu1 %vm580_vm4, %v4553_v50 }
 0x1c0   : > { %4841 = vmatpush3.msk.msra.mxu1 %vm584_vm3, %v1709_v40  ;;  %4842 = vmatprep.mubr.msk.f32.mxu1 %vm5349_vm0, %v5350_v20  ;;  %v4630_v40 = vld [vmem:[%s6275_s3 + $0x6] sm:$0x3] }
 0x1c1   : > { %4967 = vmatmul.mubr.msk.f32.vlgmr.msra.gmra.mrb[4].mxu0 %vm580_vm4, %v4619_v51  ;;  %4560 = vmatprep.subr.msk.mxu1 %vm584_vm3, %v1876_v52  ;;  %v2766_v52 = vld [vmem:[%s6277_s5 + $0xa0] sm:$0xff] }
 0x1c2   : > { %4970 = vmatpush3.msk.msra.mxu0 %vm584_vm3, %v5652_v13  ;;  %4971 = vmatprep.mubr.msk.f32.mxu0 %vm5349_vm0, %v5350_v20  ;;  %v4559_v13 = vld [vmem:[%s6272_s0 + $0x10] sm:$0x3] }
 0x1c3   : > { %4843 = vmatmul.mubr.msk.f32.vlgmr.msra.gmra.mrb[4].mxu1 %vm580_vm4, %v4553_v50  ;;  %4974 = vmatprep.subr.mxu0 %v5350_v20  ;;  %v2763_v50 = vld [vmem:[%s6277_s5 + $0x88] sm:$0xff] }
 0x1c4   : > { %4561 = vmatpush1.msk.msra.mxu1 %vm584_vm3, %v1875_v54  ;;  %1950 = vmatprep.mubr.f32.mxu1 %v5350_v20  ;;  %v5092_v54 = vpack.c.bf16 %v2769_v53, %v2766_v52 }
 0x1c5   : > { %4845 = vmatprep.subr.mxu1 %v5350_v20 }
 0x1c7   : > { %4562 = vmatmul.mubr.msk.f32.vlgmr.msra.gmra.mrb[2].mxu1 %vm580_vm4, %v4559_v13 }
 0x1c8   : > { %4846 = vmatpush3.msk.msra.mxu1 %vm584_vm3, %v1873_v49  ;;  %4847 = vmatprep.mubr.msk.f32.mxu1 %vm5349_vm0, %v5350_v20  ;;  %v2760_v49 = vld [vmem:[%s6277_s5 + $0x70] sm:$0xff] }
 0x1c9   : > { %4972 = vmatmul.mubr.msk.f32.vlgmr.msra.gmra.mrb[4].mxu0 %vm580_vm4, %v4622_v34  ;;  %5059 = vmatprep.subr.bf16.mxu1 %v5058_v56  ;;  %v5089_v51 = vpack.c.bf16 %v2763_v50, %v2760_v49  ;;  %v2778_v56 = vld [vmem:[%s6277_s5 + $0x100] sm:$0xff]  ;;  %v2784_v34 = vld [vmem:[%s6277_s5 + $0x130] sm:$0xf] }
 0x1ca   : > { %4975 = vmatpush3.msk.msra.mxu0 %vm584_vm3, %v5525_v29  ;;  %4976 = vmatprep.mubr.msk.f32.mxu0 %vm5349_vm0, %v5350_v20  ;;  %v5066_v29 = vpack.c.bf16 %v2762_v2, %v2759_v1  ;;  %v5098_v58 = vpack.c.bf16 %v2781_v57, %v2778_v56 }
 0x1cb   : > { %4848 = vmatmul.mubr.msk.f32.vlgmr.msra.gmra.mrb[4].mxu1 %vm580_vm4, %v4559_v13  ;;  %4979 = vmatprep.subr.mxu0 %v5350_v20  ;;  %v5095_v13 = vpack.c.bf16 %v2775_v55, %v2772_v42 }
 0x1cc   : > { %5061 = vmatpush1.bf16.msra.mxu1 %v5060_v61  ;;  %2862 = vmatprep.mubr.f32.mxu1 %v5350_v20 }
 0x1cd   : > { %5063 = vmatprep.subr.bf16.mxu1 %v5062_v62 }
 0x1d0   : > { %5065 = vmatpush1.bf16.msra.mxu1 %v5064_v3 }
 0x1d1   : > { %4977 = vmatmul.mubr.msk.f32.vlgmr.msra.gmra.mrb[4].mxu0 %vm580_vm4, %v3683_v6  ;;  %5067 = vmatprep.subr.bf16.mxu1 %v5066_v29 }
 0x1d2   : > { %4980 = vmatpush3.msk.msra.mxu0 %vm584_vm3, %v5666_v15  ;;  %4981 = vmatprep.mubr.msk.f32.mxu0 %vm5349_vm0, %v5350_v20  ;;  %v2770_v15 = vld [vmem:[%s6277_s5 + $0xc0] sm:$0xff] }
 0x1d3   : > { %4984 = vmatprep.subr.mxu0 %v5350_v20  ;;  %v5076_v35 = vpack.c.bf16 %v2773_v28, %v2770_v15 }
 0x1d4   : > { %5069 = vmatpush1.bf16.msra.mxu1 %v5068_v11 }
 0x1d5   : > { %5071 = vmatprep.subr.bf16.mxu1 %v5070_v12 }
 0x1d8   : > { %5073 = vmatpush1.bf16.msra.mxu1 %v5072_v23 }
 0x1d9   : > { %4982 = vmatmul.mubr.msk.f32.vlgmr.msra.gmra.mrb[4].mxu0 %vm580_vm4, %v4627_v31  ;;  %5075 = vmatprep.subr.bf16.mxu1 %v5074_v25 }
 0x1da   : > { %4985 = vmatpush3.msk.msra.mxu0 %vm584_vm3, %v5677_v17  ;;  %4986 = vmatprep.mubr.msk.f32.mxu0 %vm5349_vm0, %v5350_v20  ;;  %v2748_v17 = vld [vmem:[%s6277_s5 + $0x10] sm:$0xff] }
 0x1db   : > { %4989 = vmatprep.subr.mxu0 %v5350_v20  ;;  %v5083_v45 = vpack.c.bf16 %v2751_v43, %v2748_v17 }
 0x1dc   : > { %5077 = vmatpush1.bf16.msra.mxu1 %v5076_v35 }
 0x1dd   : > { %5079 = vmatprep.subr.bf16.mxu1 %v5078_v36 }
 0x1e0   : > { %5081 = vmatpush1.bf16.msra.mxu1 %v5080_v39 }
 0x1e1   : > { %4987 = vmatmul.mubr.msk.f32.vlgmr.msra.gmra.mrb[4].mxu0 %vm580_vm4, %v4630_v40  ;;  %4591 = vmatprep.subr.msk.mxu1 %vm424_vm1, %v2783_v41 }
 0x1e2   : > { %4990 = vmatpush3.msk.msra.mxu0 %vm584_vm3, %v5688_v19  ;;  %4991 = vmatprep.mubr.msk.f32.mxu0 %vm5349_vm0, %v5350_v20  ;;  %v5086_v19 = vpack.c.bf16 %v2757_v47, %v2754_v46 }
 0x1e3   : > { %4994 = vmatprep.subr.mxu0 %v5350_v20 }
 0x1e4   : > { %4592 = vmatpush1.msk.msra.mxu1 %vm424_vm1, %v2782_v44 }
 0x1e5   : > { %4593 = vmatmul.mubr.msk.f32.vlgmr.msra.gmra.mrb[2].mxu1 %vm2785_vm13, %v5869_v10  ;;  %5082 = vmatprep.subr.bf16.mxu1 %v5347_v8 }
 0x1e6   : > { %5084 = vmatpush3.bf16.msra.mxu1 %v5083_v45  ;;  %4921 = vmatprep.mubr.msk.f32.mxu1 %vm5349_vm0, %v5350_v20 }
 0x1e7   : > { %5085 = vmatprep.subr.bf16.mxu1 %v5347_v8 }
 0x1e9   : > { %4992 = vmatmul.mubr.msk.f32.vlgmr.msra.gmra.mrb[4].mxu0 %vm580_vm4, %v4633_v48 }
 0x1ea   : > { %5087 = vmatpush3.bf16.msra.mxu1 %v5086_v19  ;;  %4995 = vmatpush3.msk.msra.mxu0 %vm584_vm3, %v5699_v22  ;;  %v4636_v22 = vld [vmem:[%s6275_s3 + $0xa] sm:$0x3] }
 0x1eb   : > { %5088 = vmatprep.subr.bf16.mxu1 %v5347_v8  ;;  %4996 = vmatprep.mubr.msk.f32.mxu0 %vm5349_vm0, %v5350_v20 }
 0x1ec   : > { %4999 = vmatprep.subr.mxu0 %v5350_v20 }
 0x1ee   : > { %5090 = vmatpush3.bf16.msra.mxu1 %v5089_v51 }
 0x1ef   : > { %5091 = vmatprep.subr.bf16.mxu1 %v5347_v8 }
 0x1f1   : > { %4997 = vmatmul.mubr.msk.f32.vlgmr.msra.gmra.mrb[4].mxu0 %vm580_vm4, %v4636_v22 }
 0x1f2   : > { %5093 = vmatpush3.bf16.msra.mxu1 %v5092_v54  ;;  %5000 = vmatpush3.msk.msra.mxu0 %vm584_vm3, %v5710_v24  ;;  %v4639_v24 = vld [vmem:[%s6275_s3 + $0xc] sm:$0x3] }
 0x1f3   : > { %5094 = vmatprep.subr.bf16.mxu1 %v5347_v8  ;;  %5001 = vmatprep.mubr.msk.f32.mxu0 %vm5349_vm0, %v5350_v20 }
 0x1f4   : > { %5004 = vmatprep.subr.mxu0 %v5350_v20 }
 0x1f6   : > { %5096 = vmatpush3.bf16.msra.mxu1 %v5095_v13 }
 0x1f7   : > { %5097 = vmatprep.subr.bf16.mxu1 %v5347_v8  ;;  %v4642_v8 = vld [vmem:[%s6275_s3 + $0xe] sm:$0x3] }
 0x1f9   : > { %5002 = vmatmul.mubr.msk.f32.vlgmr.msra.gmra.mrb[4].mxu0 %vm580_vm4, %v4639_v24 }
 0x1fa   : > { %5099 = vmatpush3.bf16.msra.mxu1 %v5098_v58  ;;  %5005 = vmatpush3.msk.msra.mxu0 %vm584_vm3, %v5721_v26  ;;  %v4645_v26 = vld [vmem:[%s6275_s3 + $0x10] sm:$0x3] }
 0x1fb   : > { %4919 = vmatprep.subr.mxu1 %v5350_v20  ;;  %5006 = vmatprep.mubr.msk.f32.mxu0 %vm5349_vm0, %v5350_v20 }
 0x1fc   : > { %5009 = vmatprep.subr.mxu0 %v5350_v20 }
 0x1fe   : > { %4920 = vmatpush3.msk.msra.mxu1 %vm424_vm1, %v2784_v34 }
 0x1ff   : > { %4922 = vmatmul.mubr.msk.f32.vlgmr.msra.gmra.mrb[4].mxu1 %vm2785_vm13, %v5869_v10 }
 0x201   : > { %5007 = vmatmul.mubr.msk.f32.vlgmr.msra.gmra.mrb[4].mxu0 %vm580_vm4, %v4642_v8 }
 0x202   : > { %5010 = vmatpush3.msk.msra.mxu0 %vm584_vm3, %v5732_v30  ;;  %5011 = vmatprep.mubr.msk.f32.mxu0 %vm5349_vm0, %v5350_v20  ;;  %vm2964_vm0 = vcmask 259076  }
 0x203   : > { %vm2965_vm1 = vmor %vm2964_vm0, %vm2963_vm15 }
 0x209   : > { %5012 = vmatmul.mubr.msk.f32.vlgmr.msra.gmra.mrb[4].mxu0 %vm580_vm4, %v4645_v26 }
 0x2b8   : > { %v2864_v59 = vpop.f32.mrb[2].mxu1 }
 0x2b9   : > { %v2866_v60 = vpop.f32.mrb[3].mxu1 }
 0x2ba   : > { %v2945_v61 = vcombine.low %v2864_v59, %v2866_v60 }
 0x2bc   : > { %v2952_v30 = vrot.slane %v2945_v61, %v5517_v27 }
 0x2d2   : > { %v2935_v20 = vpop.f32.mrb[4].mxu1 }
 0x2d3   : > { %v2959_v10 = vrot.slane %v2935_v20, %v5517_v27  ;;  %v4923_v62 = vpop.f32.mrb[5].mxu1 }
 0x2d5   : > { %v2960_v63 = vcombine.low %v2952_v30, %v2959_v10 }
 0x2d7   : > { %2966 = vst.msk [vmem:[%s342_s17] sm:$0x3f] %vm2965_vm1, %v2960_v63 }
 0x2d8   : > { %5264 = shalt.err (!%p5261_p3)
}
 0x2d9   : > { %s5265_s21 = scalar_lea.hbm %s6191_s22, 96  ;;  %s5269_s27 = scalar_lea.hbm %s6280_s8, 192 }
 0x2da   : > { %p5266_p4 = scmp.ne.s32.totalorder %s6191_s22, %s5265_s21  ;;  %p5270_p9 = scmp.lt.u32.totalorder %s6191_s22, %s6280_s8 }
 0x2db   : > { %p5271_p10 = scmp.lt.u32.totalorder %s5269_s27, %s5265_s21  ;;  %p5273_p12 = scmp.lt.u32.totalorder %s5265_s21, %s6191_s22 }
 0x2dc   : > { %p5267_p7 = pnand %p5266_p4, %p5454_p5 }
 0x2dd   : > { %p5272_p11 = por %p5271_p10, %p5270_p9 }
 0x2de   : > { %p5268_p8 = pneg %p5267_p7 }
 0x2df   : > { %p5274_p13 = por %p5273_p12, %p5272_p11 }
 0x2e1   : > { %p5275_p0 = pnand %p5274_p13, %p5268_p8 }
 0x2e3   : > { %5278 = shalt.err (!%p5275_p0)
}
 0x2e4   : > { %5189 = dma.vmem_to_hbm [thread:$0]  (%p5454_p5), %s6193_s25, 96, %s6191_s22, %s4368_s16   ;;  %vm4365_vm2 = vcmask 648192   ;;  %v4359_v27 = vpop.f32.mrb[4].mxu0 }
 0x2e5   : > { %s6226_s17 = scalar_lea.hbm %s6281_s9, %s4650_s23  ;;  %4366 = vst.msk [vmem:[%s6196_s18] sm:$0x3] %vm4365_vm2, %v4359_v27  ;;  %v5013_v0 = vpop.f32.mrb[5].mxu0  ;;  %s4373_s21 = scalar_lea.sflag [#allocation5], %s6180_s14 }
 0x2e6   : > { %s5279_s26 = scalar_lea.vmem %s6230_s24, 32  ;;  %s5365_s13 = smov [#allocation4]  }
 0x2e7   : > { %p5280_p1 = scmp.ne.s32.totalorder %s6230_s24, %s5279_s26  ;;  %s5283_s25 = sshll.u32 %s5365_s13, 4  ;;  %s5284_s25 = int_to_ptr.vmem [resolvable:$false] %s5283_s25 }
 0x2e8   : > { %s5285_s22 = scalar_lea.vmem %s5284_s25, 64  ;;  %p5286_p4 = scmp.lt.s32.totalorder %s6230_s24, %s5284_s25 }
 0x2e9   : > { %p5281_p2 = pnand %p5280_p1, %p5454_p5  ;;  %p5287_p7 = scmp.lt.s32.totalorder %s5285_s22, %s5279_s26 }
 0x2eb   : > { %p5282_p3 = pneg %p5281_p2  ;;  %p5288_p8 = por %p5287_p7, %p5286_p4 }
 0x2ed   : > { %p5289_p9 = pnand %p5288_p8, %p5282_p3 }
 0x2ef   : > { %5292 = shalt.err (!%p5289_p9)
}
 0x2f0   : > { %s5293_s14 = scalar_lea.hbm %s6226_s17, 32  ;;  %s5297_s16 = scalar_lea.hbm %s6281_s9, 64 }
 0x2f1   : > { %p5294_p10 = scmp.ne.s32.totalorder %s6226_s17, %s5293_s14  ;;  %p5298_p13 = scmp.lt.u32.totalorder %s6226_s17, %s6281_s9 }
 0x2f2   : > { %p5299_p0 = scmp.lt.u32.totalorder %s5297_s16, %s5293_s14  ;;  %p5301_p2 = scmp.lt.u32.totalorder %s5293_s14, %s6226_s17 }
 0x2f3   : > { %p5295_p11 = pnand %p5294_p10, %p5454_p5 }
 0x2f4   : > { %p5300_p1 = por %p5299_p0, %p5298_p13 }
 0x2f5   : > { %p5296_p12 = pneg %p5295_p11 }
 0x2f6   : > { %p5302_p3 = por %p5301_p2, %p5300_p1 }
 0x2f8   : > { %p5303_p4 = pnand %p5302_p3, %p5296_p12 }
 0x2fa   : > { %5306 = shalt.err (!%p5303_p4)
}
 0x2fb   : > { %5190 = dma.vmem_to_hbm [thread:$0]  (%p5454_p5), %s6230_s24, 32, %s6226_s17, %s4373_s21  }
 0x2fc PF: > { %p5200_p7 = scmp.ge.s32.totalorder %s5345_s12, 2  ;;  %s4412_s28 = sand.u32 1, %s5333_s30  }
 0x2fd   : > { %s4413_s29 = scalar_lea.sflag [#allocation3], %s4412_s28 }
 0x2fe   : > { %p5194_p8 = pnand %p5200_p7, %p5458_p6 }
 0x300   : > { %5324 = dma.done.wait (!%p5194_p8), %s4413_s29, 96  }
 0x301   : > { %5326 = vsyncadd (!%p5194_p8), %s4413_s29, 4294967200  ;;  %s4422_s15 = scalar_lea.sflag [#allocation5], %s4412_s28 }
 0x302   : > { %5328 = dma.done.wait (!%p5194_p8), %s4422_s15, 32  }
 0x303   : > { %5330 = vsyncadd (!%p5194_p8), %s4422_s15, 4294967264  ;;  %s6293_s12 = sld [smem:[#allocation9_spill]]  ;;  %s6294_s19 = sld [smem:[#allocation8_spill]] }
 0x304   : > { %s6295_s11 = sld [smem:[#allocation10_spill]]  ;;  %s6296_s30 = smov %s5337_s10 }
 0x309   : > { %p23_p5 = scmp.ge.s32.totalorder %s6293_s12, 4   ;;  %s6297_s10 = smov %s6294_s19 }
 0x30b   :  { %25 = sbr.rel (!%p23_p5) target bundleno = 5 (0x5), region = 139 }
 0x312   :  { %4427 = vsyncpa [#allocation3], 1 }
 0x313   :  { %4429 = vsyncpa [#allocation3 + $0x1], 1 }
 0x314   :  { %4430 = vsyncpa [#allocation5], 1 }
 0x315   :  { %4432 = vsyncpa [#allocation5 + $0x1], 1 }

</bundles_post_ra>
